<compile_context>
chip_gen: v7x
topology: tpu7x:2x2x1
jax: 0.10.0
libtpu: 0.0.40
codegen_flags: <defaults>
</compile_context>

<pallas_src>
import functools

import jax
import jax.numpy as jnp
import numpy as np
from jax import lax
from jax.experimental import pallas as pl
from jax.experimental.pallas import tpu as pltpu

_EPS = 1e-5

# ---- packed parameter slab: column layout of the single (Cu, K) f32 input ---
_G1, _B1, _BUP, _G2, _B2, _G3, _B3 = 0, 1, 2, 3, 4, 5, 6
_WDT = 8                                   # (Cd, Cu) project_down weight^T


def _wup_off(cu):                          # (Cd, Cu) project_up weight (native)
    return _WDT + cu


def _wdw_off(cu):                          # (Cd, 9) depthwise weights^T
    return _WDT + 2 * cu


def _pcols(cu):
    return _WDT + 2 * cu + 9


def _elu(v):
    # PyTorch F.elu, alpha=1 (exp clamped so the untaken branch can't NaN).
    return jnp.where(v > 0, v, jnp.exp(jnp.minimum(v, 0.0)) - 1.0)


def resnet_block_kernel(
    x_ref,            # (Cu, NHW)  channels on sublanes, flattened spatial on lanes
    p_ref,            # (Cu, K)    packed params (see column layout above)
    out_ref,          # (Cu, NHW)  lane-dense output slab (aliased onto x's buffer)
    *, dil, H, W, Cd,
):
    Cu, NHW = x_ref.shape
    inv_n = 1.0 / NHW

    # Per-channel lane sums on the (otherwise idle) MXU -- the XLU is reserved
    # for the 8 depthwise rolls below.
    ones_col = jnp.ones((NHW, 1), jnp.float32)

    def stats(v):
        # Two-pass (shifted) moments: centered sum-of-squares avoids the
        # catastrophic cancellation of E[x^2] - mean^2; same VPU op count and
        # the centered value is reused by the BN apply.
        mu = jnp.dot(v, ones_col, preferred_element_type=jnp.float32) * inv_n
        c = v - mu
        var = jnp.dot(c * c, ones_col, preferred_element_type=jnp.float32) * inv_n
        return c, var

    def bn_apply(c, var, g, b):
        return c * (lax.rsqrt(var + _EPS) * g) + b

    x = x_ref[...]                                   # read once; reused as residual

    # --- bn1 + elu ------------------------------------------------------------
    c1, v1 = stats(x)
    h = _elu(bn_apply(c1, v1, p_ref[:, _G1:_G1 + 1], p_ref[:, _B1:_B1 + 1]))

    # --- project_down: (Cd, Cu) @ (Cu, NHW).  Conv bias omitted: it is a
    # per-channel constant removed exactly by bn2's mean subtraction. ---------
    wdT = p_ref[:Cd, _WDT:_WDT + Cu]                 # (Cd, Cu)
    h = jnp.dot(wdT, h, preferred_element_type=jnp.float32)

    # --- bn2 + elu ------------------------------------------------------------
    c2, v2 = stats(h)
    h = _elu(bn_apply(c2, v2, p_ref[:Cd, _G2:_G2 + 1], p_ref[:Cd, _B2:_B2 + 1]))

    # --- depthwise dilated 3x3 conv (groups == channels) -----------------------
    # Tap (ky, kx): out(n,h,w) += w_k[c] * in(n, h+(ky-1)*dil, w+(kx-1)*dil);
    # in the flattened index that is a lane shift of s = (ky-1)*dil*W+(kx-1)*dil.
    # Border / cross-image validity masks are generated in-kernel from a lane
    # iota (no (9, NHW) HBM mask input).  f32 floor-division is exact for
    # NHW < 2**23 (asserted in the wrapper) and uses only guaranteed VPU ops.
    # Roll wrap-around only ever lands on masked lanes (a valid tap's source is
    # inside the same image, hence inside [0, NHW)).
    lane = lax.broadcasted_iota(jnp.int32, (1, NHW), 1).astype(jnp.float32)
    row = jnp.floor(lane * (1.0 / W))                # global row  = lane // W
    ww = lane - row * W                              # in-row col  = lane %  W
    hh = row - jnp.floor(row * (1.0 / H)) * H        # in-image row = row % H

    def tap_mask(dy, dx):                            # (1, NHW) bool
        conds = []
        if dy < 0:
            conds.append(hh >= -dy)
        if dy > 0:
            conds.append(hh < H - dy)
        if dx < 0:
            conds.append(ww >= -dx)
        if dx > 0:
            conds.append(ww < W - dx)
        m = conds[0]
        for c in conds[1:]:
            m = m & c
        return m

    dw = _wdw_off(Cu)
    wdw_col = lambda k: p_ref[:Cd, dw + k:dw + k + 1]    # (Cd, 1)

    # Conv bias omitted: cancelled by bn3's mean subtraction (survives the fold
    # below, since adding a constant shifts acc and its mean identically).
    acc = h * wdw_col(4)                                 # center tap: no shift/mask
    for k in range(9):
        if k == 4:
            continue
        ky, kx = divmod(k, 3)
        dy, dx = (ky - 1) * dil, (kx - 1) * dil
        s = dy * W + dx
        tap = pltpu.roll(h, (-s) % NHW, axis=1)          # tap[i] = h[i + s] (valid lanes)
        acc = acc + jnp.where(tap_mask(dy, dx), tap * wdw_col(k), 0.0)
        # TODO(synk): once NHW is tiled, drop the mask select on interior tiles
        # (classify tiles statically) and cast this tap path to bf16 on v6e/v7x
        # (f32 accumulation); keep f32 on v5e (no bf16 VALU).

    # --- bn3 folded into project_up --------------------------------------------
    # No nonlinearity between bn3 and project_up, so the affine commutes into
    # the 1x1 weights: z = (scale3 * W_up)^T @ (acc - mu3) + W_up^T @ b3 + b_up.
    # The (Cd, NHW) elementwise BN-apply pass disappears; replacement work is
    # O(Cd*Cu) on the idle MXU.
    c3, v3 = stats(acc)
    scale3 = lax.rsqrt(v3 + _EPS) * p_ref[:Cd, _G3:_G3 + 1]        # (Cd, 1)
    w_up = p_ref[:Cd, _wup_off(Cu):_wup_off(Cu) + Cu]              # (Cd, Cu)
    tdims = (((0,), (0,)), ((), ()))                               # A^T @ B
    z = lax.dot_general(w_up * scale3, c3, tdims,
                        preferred_element_type=jnp.float32)        # (Cu, NHW)
    bias = lax.dot_general(w_up, p_ref[:Cd, _B3:_B3 + 1], tdims,
                           preferred_element_type=jnp.float32)     # (Cu, 1)
    bias = bias + p_ref[:, _BUP:_BUP + 1]

    # --- residual + store (lane-dense slab; NHW multiple of 128 -> unmasked vst)
    out_ref[...] = z + bias + x


def _pack_params(params, cu, cd):
    """Pack the 7 per-channel vectors + 3 small weights into one (Cu, 49) slab.

    One parameter DMA instead of ~11 tiny (8,128)-padded transfers.  (In a real
    model this packing would be done once at parameter-load time.)
    """
    P = jnp.zeros((cu, _pcols(cu)), jnp.float32)
    P = P.at[:, _G1].set(params["g1"].reshape(cu))
    P = P.at[:, _B1].set(params["b1"].reshape(cu))
    P = P.at[:, _BUP].set(params["b_up"].reshape(cu))
    P = P.at[:cd, _G2].set(params["g2"].reshape(cd))
    P = P.at[:cd, _B2].set(params["b2"].reshape(cd))
    P = P.at[:cd, _G3].set(params["g3"].reshape(cd))
    P = P.at[:cd, _B3].set(params["b3"].reshape(cd))
    P = P.at[:cd, _WDT:_WDT + cu].set(jnp.transpose(params["w_down"]))     # (Cd, Cu)
    P = P.at[:cd, _wup_off(cu):_wup_off(cu) + cu].set(params["w_up"])      # (Cd, Cu)
    P = P.at[:cd, _wdw_off(cu):_wdw_off(cu) + 9].set(jnp.transpose(params["w_dw"]))
    return P


@functools.partial(jax.jit, static_argnames=("dil",))
def resnet_block(x_nchw, params, *, dil):
    """Forward pass. x_nchw: (N, Cu, H, W) float32 (PyTorch layout)."""
    x = x_nchw.astype(jnp.float32)
    N, Cu, H, W = x.shape
    Cd = params["w_down"].shape[1]
    nhw = N * H * W
    # In-kernel f32 iota row/col decomposition is exact below 2**23 lanes; the
    # border masks also make the lane rolls safe for any dilation (wrapped
    # lanes are always masked).
    assert nhw < (1 << 23), "tile the NHW axis before growing this large"

    # Layout plumbing: channels -> sublanes, flattened spatial -> lanes.
    # TODO(synk): at realistic AlphaFold sizes, skip this HBM transpose by
    # feeding the free (N, Cu, H*W) view through a 3-D BlockSpec, tile the
    # spatial axis (two-pass BN: stats pass + apply pass, halo for the dilated
    # taps), and mark the tiled axis "parallel" in dimension_semantics so v7x
    # megacore uses both TensorCores.
    x_c = jnp.transpose(x, (1, 0, 2, 3)).reshape(Cu, nhw)
    p = _pack_params(params, Cu, Cd)

    kernel = functools.partial(resnet_block_kernel, dil=dil, H=H, W=W, Cd=Cd)
    out = pl.pallas_call(
        kernel,
        out_shape=jax.ShapeDtypeStruct((Cu, nhw), jnp.float32),
        # The residual is fully read into VMEM before writeback, so the result
        # can be written back into x_c's HBM buffer instead of a fresh slab.
        input_output_aliases={0: 0},
        compiler_params=pltpu.CompilerParams(
            # Monolithic single-block kernel: raise the scoped-VMEM limit above
            # the 16/32 MiB v5e/v6e defaults (still <= v7x's 64 MiB physical).
            vmem_limit_bytes=64 * 1024 * 1024,
        ),
    )(x_c, p)
    return jnp.transpose(out.reshape(Cu, N, H, W), (1, 0, 2, 3))


# ------------------------ pure-JAX reference (for check) ---------------------
def ref_forward(x_nchw, params, dil):
    x = jnp.transpose(x_nchw, (0, 2, 3, 1)).astype(jnp.float32)
    Cd = params["w_down"].shape[1]

    def bn(v, g, b):
        mu = jnp.mean(v, axis=(0, 1, 2), keepdims=True)
        var = jnp.mean((v - mu) ** 2, axis=(0, 1, 2), keepdims=True)
        return (v - mu) * jax.lax.rsqrt(var + _EPS) * g.reshape(1, 1, 1, -1) \
            + b.reshape(1, 1, 1, -1)

    h = _elu(bn(x, params["g1"], params["b1"]))
    h = jnp.einsum("nhwc,cd->nhwd", h, params["w_down"]) \
        + params["b_down"].reshape(1, 1, 1, -1)
    h = _elu(bn(h, params["g2"], params["b2"]))
    wdw = params["w_dw"].reshape(3, 3, 1, Cd)                     # HWIO depthwise
    h = jax.lax.conv_general_dilated(
        h, wdw, window_strides=(1, 1),
        padding=[(dil, dil), (dil, dil)], rhs_dilation=(dil, dil),
        dimension_numbers=("NHWC", "HWIO", "NHWC"),
        feature_group_count=Cd,
    ) + params["b_dw"].reshape(1, 1, 1, -1)
    h = bn(h, params["g3"], params["b3"])
    h = jnp.einsum("nhwc,cd->nhwd", h, params["w_up"]) \
        + params["b_up"].reshape(1, 1, 1, -1)
    return jnp.transpose(h + x, (0, 3, 1, 2))


if __name__ == "__main__":
    N, Cu, Cd, H, W, dil = 2, 16, 8, 12, 16, 2   # up_size=16, down_size=8, dilation=2

    keys = jax.random.split(jax.random.PRNGKey(0), 14)
    nrm = lambda k, s, sc: sc * jax.random.normal(k, s, jnp.float32)
    params = {
        "g1": 1.0 + nrm(keys[0], (1, Cu), 0.1), "b1": nrm(keys[1], (1, Cu), 0.1),
        "w_down": nrm(keys[2], (Cu, Cd), 0.2),  "b_down": nrm(keys[3], (1, Cd), 0.1),
        "g2": 1.0 + nrm(keys[4], (1, Cd), 0.1), "b2": nrm(keys[5], (1, Cd), 0.1),
        "w_dw": nrm(keys[6], (9, Cd), 0.2),     "b_dw": nrm(keys[7], (1, Cd), 0.1),
        "g3": 1.0 + nrm(keys[8], (1, Cd), 0.1), "b3": nrm(keys[9], (1, Cd), 0.1),
        "w_up": nrm(keys[10], (Cd, Cu), 0.2),   "b_up": nrm(keys[11], (1, Cu), 0.1),
    }
    x = jax.random.normal(keys[13], (N, Cu, H, W), jnp.float32)   # NCHW input

    out = resnet_block(x, params, dil=dil)
    jax.block_until_ready(out)

    ref = ref_forward(x, params, dil)
    np.testing.assert_allclose(np.asarray(out), np.asarray(ref), rtol=1e-3, atol=1e-3)
    print("KERNEL_OK")
</pallas_src>

<mosaic_0001>
module attributes {stable_mosaic.version = 11 : i64} {
  func.func @resnet_block_kernel(%arg0: memref<16x384xf32, #tpu.memory_space<vmem>>, %arg1: memref<16x49xf32, #tpu.memory_space<vmem>>, %arg2: memref<16x384xf32, #tpu.memory_space<vmem>>) attributes {dimension_semantics = [], scalar_prefetch = 0 : i64, scratch_operands = 0 : i64, tpu.core_type = #tpu.core_type<tc>} {
    %cst = arith.constant 1.000000e+00 : f32
    %0 = vector.broadcast %cst : f32 to vector<384x1xf32>
    %c0 = arith.constant 0 : index
    %c0_0 = arith.constant 0 : index
    %1 = vector.load %arg0[%c0, %c0_0] : memref<16x384xf32, #tpu.memory_space<vmem>>, vector<16x384xf32>
    %cst_1 = arith.constant dense<0.000000e+00> : vector<16x1xf32>
    %2 = tpu.matmul %1, %0, %cst_1 {dimension_numbers = #tpu.dot_dimension_numbers<[1], [0], [0], [1], [0, 0, 1, 1], [], []>} : vector<16x384xf32>, vector<384x1xf32>, vector<16x1xf32> -> vector<16x1xf32>
    %cst_2 = arith.constant 0.00260416674 : f32
    %3 = vector.broadcast %cst_2 : f32 to vector<16x1xf32>
    %4 = arith.mulf %2, %3 : vector<16x1xf32>
    %5 = vector.broadcast %4 : vector<16x1xf32> to vector<16x384xf32>
    %6 = arith.subf %1, %5 : vector<16x384xf32>
    %7 = arith.mulf %6, %6 : vector<16x384xf32>
    %cst_3 = arith.constant dense<0.000000e+00> : vector<16x1xf32>
    %8 = tpu.matmul %7, %0, %cst_3 {dimension_numbers = #tpu.dot_dimension_numbers<[1], [0], [0], [1], [0, 0, 1, 1], [], []>} : vector<16x384xf32>, vector<384x1xf32>, vector<16x1xf32> -> vector<16x1xf32>
    %cst_4 = arith.constant 0.00260416674 : f32
    %9 = vector.broadcast %cst_4 : f32 to vector<16x1xf32>
    %10 = arith.mulf %8, %9 : vector<16x1xf32>
    %c0_5 = arith.constant 0 : index
    %c0_6 = arith.constant 0 : index
    %11 = vector.load %arg1[%c0_5, %c0_6] : memref<16x49xf32, #tpu.memory_space<vmem>>, vector<16x1xf32>
    %c0_7 = arith.constant 0 : index
    %c1 = arith.constant 1 : index
    %12 = vector.load %arg1[%c0_7, %c1] : memref<16x49xf32, #tpu.memory_space<vmem>>, vector<16x1xf32>
    %cst_8 = arith.constant 9.99999974E-6 : f32
    %13 = vector.broadcast %cst_8 : f32 to vector<16x1xf32>
    %14 = arith.addf %10, %13 : vector<16x1xf32>
    %15 = math.rsqrt %14 : vector<16x1xf32>
    %16 = arith.mulf %15, %11 : vector<16x1xf32>
    %17 = vector.broadcast %16 : vector<16x1xf32> to vector<16x384xf32>
    %18 = arith.mulf %6, %17 : vector<16x384xf32>
    %19 = vector.broadcast %12 : vector<16x1xf32> to vector<16x384xf32>
    %20 = arith.addf %18, %19 : vector<16x384xf32>
    %cst_9 = arith.constant 0.000000e+00 : f32
    %21 = vector.broadcast %cst_9 : f32 to vector<16x384xf32>
    %22 = arith.cmpf ogt, %20, %21 : vector<16x384xf32>
    %cst_10 = arith.constant 0.000000e+00 : f32
    %23 = vector.broadcast %cst_10 : f32 to vector<16x384xf32>
    %24 = arith.minimumf %20, %23 : vector<16x384xf32>
    %25 = math.exp %24 : vector<16x384xf32>
    %cst_11 = arith.constant 1.000000e+00 : f32
    %26 = vector.broadcast %cst_11 : f32 to vector<16x384xf32>
    %27 = arith.subf %25, %26 : vector<16x384xf32>
    %28 = arith.select %22, %20, %27 : vector<16x384xi1>, vector<16x384xf32>
    %c0_12 = arith.constant 0 : index
    %c8 = arith.constant 8 : index
    %29 = vector.load %arg1[%c0_12, %c8] : memref<16x49xf32, #tpu.memory_space<vmem>>, vector<8x16xf32>
    %cst_13 = arith.constant dense<0.000000e+00> : vector<8x384xf32>
    %30 = tpu.matmul %29, %28, %cst_13 {dimension_numbers = #tpu.dot_dimension_numbers<[1], [0], [0], [1], [0, 0, 1, 1], [], []>} : vector<8x16xf32>, vector<16x384xf32>, vector<8x384xf32> -> vector<8x384xf32>
    %cst_14 = arith.constant dense<0.000000e+00> : vector<8x1xf32>
    %31 = tpu.matmul %30, %0, %cst_14 {dimension_numbers = #tpu.dot_dimension_numbers<[1], [0], [0], [1], [0, 0, 1, 1], [], []>} : vector<8x384xf32>, vector<384x1xf32>, vector<8x1xf32> -> vector<8x1xf32>
    %cst_15 = arith.constant 0.00260416674 : f32
    %32 = vector.broadcast %cst_15 : f32 to vector<8x1xf32>
    %33 = arith.mulf %31, %32 : vector<8x1xf32>
    %34 = vector.broadcast %33 : vector<8x1xf32> to vector<8x384xf32>
    %35 = arith.subf %30, %34 : vector<8x384xf32>
    %36 = arith.mulf %35, %35 : vector<8x384xf32>
    %cst_16 = arith.constant dense<0.000000e+00> : vector<8x1xf32>
    %37 = tpu.matmul %36, %0, %cst_16 {dimension_numbers = #tpu.dot_dimension_numbers<[1], [0], [0], [1], [0, 0, 1, 1], [], []>} : vector<8x384xf32>, vector<384x1xf32>, vector<8x1xf32> -> vector<8x1xf32>
    %cst_17 = arith.constant 0.00260416674 : f32
    %38 = vector.broadcast %cst_17 : f32 to vector<8x1xf32>
    %39 = arith.mulf %37, %38 : vector<8x1xf32>
    %c0_18 = arith.constant 0 : index
    %c3 = arith.constant 3 : index
    %40 = vector.load %arg1[%c0_18, %c3] : memref<16x49xf32, #tpu.memory_space<vmem>>, vector<8x1xf32>
    %c0_19 = arith.constant 0 : index
    %c4 = arith.constant 4 : index
    %41 = vector.load %arg1[%c0_19, %c4] : memref<16x49xf32, #tpu.memory_space<vmem>>, vector<8x1xf32>
    %cst_20 = arith.constant 9.99999974E-6 : f32
    %42 = vector.broadcast %cst_20 : f32 to vector<8x1xf32>
    %43 = arith.addf %39, %42 : vector<8x1xf32>
    %44 = math.rsqrt %43 : vector<8x1xf32>
    %45 = arith.mulf %44, %40 : vector<8x1xf32>
    %46 = vector.broadcast %45 : vector<8x1xf32> to vector<8x384xf32>
    %47 = arith.mulf %35, %46 : vector<8x384xf32>
    %48 = vector.broadcast %41 : vector<8x1xf32> to vector<8x384xf32>
    %49 = arith.addf %47, %48 : vector<8x384xf32>
    %cst_21 = arith.constant 0.000000e+00 : f32
    %50 = vector.broadcast %cst_21 : f32 to vector<8x384xf32>
    %51 = arith.cmpf ogt, %49, %50 : vector<8x384xf32>
    %cst_22 = arith.constant 0.000000e+00 : f32
    %52 = vector.broadcast %cst_22 : f32 to vector<8x384xf32>
    %53 = arith.minimumf %49, %52 : vector<8x384xf32>
    %54 = math.exp %53 : vector<8x384xf32>
    %cst_23 = arith.constant 1.000000e+00 : f32
    %55 = vector.broadcast %cst_23 : f32 to vector<8x384xf32>
    %56 = arith.subf %54, %55 : vector<8x384xf32>
    %57 = arith.select %51, %49, %56 : vector<8x384xi1>, vector<8x384xf32>
    %58 = tpu.iota {dimensions = array<i32: 1>} : vector<1x384xi32>
    %59 = arith.sitofp %58 : vector<1x384xi32> to vector<1x384xf32>
    %cst_24 = arith.constant 6.250000e-02 : f32
    %60 = vector.broadcast %cst_24 : f32 to vector<1x384xf32>
    %61 = arith.mulf %59, %60 : vector<1x384xf32>
    %62 = math.floor %61 : vector<1x384xf32>
    %cst_25 = arith.constant 1.600000e+01 : f32
    %63 = vector.broadcast %cst_25 : f32 to vector<1x384xf32>
    %64 = arith.mulf %62, %63 : vector<1x384xf32>
    %65 = arith.subf %59, %64 : vector<1x384xf32>
    %cst_26 = arith.constant 0.0833333358 : f32
    %66 = vector.broadcast %cst_26 : f32 to vector<1x384xf32>
    %67 = arith.mulf %62, %66 : vector<1x384xf32>
    %68 = math.floor %67 : vector<1x384xf32>
    %cst_27 = arith.constant 1.200000e+01 : f32
    %69 = vector.broadcast %cst_27 : f32 to vector<1x384xf32>
    %70 = arith.mulf %68, %69 : vector<1x384xf32>
    %71 = arith.subf %62, %70 : vector<1x384xf32>
    %c0_28 = arith.constant 0 : index
    %c44 = arith.constant 44 : index
    %72 = vector.load %arg1[%c0_28, %c44] : memref<16x49xf32, #tpu.memory_space<vmem>>, vector<8x1xf32>
    %73 = vector.broadcast %72 : vector<8x1xf32> to vector<8x384xf32>
    %74 = arith.mulf %57, %73 : vector<8x384xf32>
    %c34_i32 = arith.constant 34 : i32
    %75 = tpu.dynamic_rotate %57 by %c34_i32 dim 1 : vector<8x384xf32>, i32 -> vector<8x384xf32>
    %cst_29 = arith.constant 2.000000e+00 : f32
    %76 = vector.broadcast %cst_29 : f32 to vector<1x384xf32>
    %77 = arith.cmpf oge, %71, %76 : vector<1x384xf32>
    %cst_30 = arith.constant 2.000000e+00 : f32
    %78 = vector.broadcast %cst_30 : f32 to vector<1x384xf32>
    %79 = arith.cmpf oge, %65, %78 : vector<1x384xf32>
    %80 = arith.andi %77, %79 : vector<1x384xi1>
    %c0_31 = arith.constant 0 : index
    %c40 = arith.constant 40 : index
    %81 = vector.load %arg1[%c0_31, %c40] : memref<16x49xf32, #tpu.memory_space<vmem>>, vector<8x1xf32>
    %82 = vector.broadcast %81 : vector<8x1xf32> to vector<8x384xf32>
    %83 = arith.mulf %75, %82 : vector<8x384xf32>
    %cst_32 = arith.constant 0.000000e+00 : f32
    %84 = vector.shape_cast %80 : vector<1x384xi1> to vector<1x384xi1>
    %85 = vector.broadcast %84 : vector<1x384xi1> to vector<8x384xi1>
    %86 = vector.broadcast %cst_32 : f32 to vector<8x384xf32>
    %87 = arith.select %85, %83, %86 : vector<8x384xi1>, vector<8x384xf32>
    %88 = arith.addf %74, %87 : vector<8x384xf32>
    %c32_i32 = arith.constant 32 : i32
    %89 = tpu.dynamic_rotate %57 by %c32_i32 dim 1 : vector<8x384xf32>, i32 -> vector<8x384xf32>
    %cst_33 = arith.constant 2.000000e+00 : f32
    %90 = vector.broadcast %cst_33 : f32 to vector<1x384xf32>
    %91 = arith.cmpf oge, %71, %90 : vector<1x384xf32>
    %c0_34 = arith.constant 0 : index
    %c41 = arith.constant 41 : index
    %92 = vector.load %arg1[%c0_34, %c41] : memref<16x49xf32, #tpu.memory_space<vmem>>, vector<8x1xf32>
    %93 = vector.broadcast %92 : vector<8x1xf32> to vector<8x384xf32>
    %94 = arith.mulf %89, %93 : vector<8x384xf32>
    %cst_35 = arith.constant 0.000000e+00 : f32
    %95 = vector.shape_cast %91 : vector<1x384xi1> to vector<1x384xi1>
    %96 = vector.broadcast %95 : vector<1x384xi1> to vector<8x384xi1>
    %97 = vector.broadcast %cst_35 : f32 to vector<8x384xf32>
    %98 = arith.select %96, %94, %97 : vector<8x384xi1>, vector<8x384xf32>
    %99 = arith.addf %88, %98 : vector<8x384xf32>
    %c30_i32 = arith.constant 30 : i32
    %100 = tpu.dynamic_rotate %57 by %c30_i32 dim 1 : vector<8x384xf32>, i32 -> vector<8x384xf32>
    %cst_36 = arith.constant 2.000000e+00 : f32
    %101 = vector.broadcast %cst_36 : f32 to vector<1x384xf32>
    %102 = arith.cmpf oge, %71, %101 : vector<1x384xf32>
    %cst_37 = arith.constant 1.400000e+01 : f32
    %103 = vector.broadcast %cst_37 : f32 to vector<1x384xf32>
    %104 = arith.cmpf olt, %65, %103 : vector<1x384xf32>
    %105 = arith.andi %102, %104 : vector<1x384xi1>
    %c0_38 = arith.constant 0 : index
    %c42 = arith.constant 42 : index
    %106 = vector.load %arg1[%c0_38, %c42] : memref<16x49xf32, #tpu.memory_space<vmem>>, vector<8x1xf32>
    %107 = vector.broadcast %106 : vector<8x1xf32> to vector<8x384xf32>
    %108 = arith.mulf %100, %107 : vector<8x384xf32>
    %cst_39 = arith.constant 0.000000e+00 : f32
    %109 = vector.shape_cast %105 : vector<1x384xi1> to vector<1x384xi1>
    %110 = vector.broadcast %109 : vector<1x384xi1> to vector<8x384xi1>
    %111 = vector.broadcast %cst_39 : f32 to vector<8x384xf32>
    %112 = arith.select %110, %108, %111 : vector<8x384xi1>, vector<8x384xf32>
    %113 = arith.addf %99, %112 : vector<8x384xf32>
    %c2_i32 = arith.constant 2 : i32
    %114 = tpu.dynamic_rotate %57 by %c2_i32 dim 1 : vector<8x384xf32>, i32 -> vector<8x384xf32>
    %cst_40 = arith.constant 2.000000e+00 : f32
    %115 = vector.broadcast %cst_40 : f32 to vector<1x384xf32>
    %116 = arith.cmpf oge, %65, %115 : vector<1x384xf32>
    %c0_41 = arith.constant 0 : index
    %c43 = arith.constant 43 : index
    %117 = vector.load %arg1[%c0_41, %c43] : memref<16x49xf32, #tpu.memory_space<vmem>>, vector<8x1xf32>
    %118 = vector.broadcast %117 : vector<8x1xf32> to vector<8x384xf32>
    %119 = arith.mulf %114, %118 : vector<8x384xf32>
    %cst_42 = arith.constant 0.000000e+00 : f32
    %120 = vector.shape_cast %116 : vector<1x384xi1> to vector<1x384xi1>
    %121 = vector.broadcast %120 : vector<1x384xi1> to vector<8x384xi1>
    %122 = vector.broadcast %cst_42 : f32 to vector<8x384xf32>
    %123 = arith.select %121, %119, %122 : vector<8x384xi1>, vector<8x384xf32>
    %124 = arith.addf %113, %123 : vector<8x384xf32>
    %c382_i32 = arith.constant 382 : i32
    %125 = tpu.dynamic_rotate %57 by %c382_i32 dim 1 : vector<8x384xf32>, i32 -> vector<8x384xf32>
    %cst_43 = arith.constant 1.400000e+01 : f32
    %126 = vector.broadcast %cst_43 : f32 to vector<1x384xf32>
    %127 = arith.cmpf olt, %65, %126 : vector<1x384xf32>
    %c0_44 = arith.constant 0 : index
    %c45 = arith.constant 45 : index
    %128 = vector.load %arg1[%c0_44, %c45] : memref<16x49xf32, #tpu.memory_space<vmem>>, vector<8x1xf32>
    %129 = vector.broadcast %128 : vector<8x1xf32> to vector<8x384xf32>
    %130 = arith.mulf %125, %129 : vector<8x384xf32>
    %cst_45 = arith.constant 0.000000e+00 : f32
    %131 = vector.shape_cast %127 : vector<1x384xi1> to vector<1x384xi1>
    %132 = vector.broadcast %131 : vector<1x384xi1> to vector<8x384xi1>
    %133 = vector.broadcast %cst_45 : f32 to vector<8x384xf32>
    %134 = arith.select %132, %130, %133 : vector<8x384xi1>, vector<8x384xf32>
    %135 = arith.addf %124, %134 : vector<8x384xf32>
    %c354_i32 = arith.constant 354 : i32
    %136 = tpu.dynamic_rotate %57 by %c354_i32 dim 1 : vector<8x384xf32>, i32 -> vector<8x384xf32>
    %cst_46 = arith.constant 1.000000e+01 : f32
    %137 = vector.broadcast %cst_46 : f32 to vector<1x384xf32>
    %138 = arith.cmpf olt, %71, %137 : vector<1x384xf32>
    %cst_47 = arith.constant 2.000000e+00 : f32
    %139 = vector.broadcast %cst_47 : f32 to vector<1x384xf32>
    %140 = arith.cmpf oge, %65, %139 : vector<1x384xf32>
    %141 = arith.andi %138, %140 : vector<1x384xi1>
    %c0_48 = arith.constant 0 : index
    %c46 = arith.constant 46 : index
    %142 = vector.load %arg1[%c0_48, %c46] : memref<16x49xf32, #tpu.memory_space<vmem>>, vector<8x1xf32>
    %143 = vector.broadcast %142 : vector<8x1xf32> to vector<8x384xf32>
    %144 = arith.mulf %136, %143 : vector<8x384xf32>
    %cst_49 = arith.constant 0.000000e+00 : f32
    %145 = vector.shape_cast %141 : vector<1x384xi1> to vector<1x384xi1>
    %146 = vector.broadcast %145 : vector<1x384xi1> to vector<8x384xi1>
    %147 = vector.broadcast %cst_49 : f32 to vector<8x384xf32>
    %148 = arith.select %146, %144, %147 : vector<8x384xi1>, vector<8x384xf32>
    %149 = arith.addf %135, %148 : vector<8x384xf32>
    %c352_i32 = arith.constant 352 : i32
    %150 = tpu.dynamic_rotate %57 by %c352_i32 dim 1 : vector<8x384xf32>, i32 -> vector<8x384xf32>
    %cst_50 = arith.constant 1.000000e+01 : f32
    %151 = vector.broadcast %cst_50 : f32 to vector<1x384xf32>
    %152 = arith.cmpf olt, %71, %151 : vector<1x384xf32>
    %c0_51 = arith.constant 0 : index
    %c47 = arith.constant 47 : index
    %153 = vector.load %arg1[%c0_51, %c47] : memref<16x49xf32, #tpu.memory_space<vmem>>, vector<8x1xf32>
    %154 = vector.broadcast %153 : vector<8x1xf32> to vector<8x384xf32>
    %155 = arith.mulf %150, %154 : vector<8x384xf32>
    %cst_52 = arith.constant 0.000000e+00 : f32
    %156 = vector.shape_cast %152 : vector<1x384xi1> to vector<1x384xi1>
    %157 = vector.broadcast %156 : vector<1x384xi1> to vector<8x384xi1>
    %158 = vector.broadcast %cst_52 : f32 to vector<8x384xf32>
    %159 = arith.select %157, %155, %158 : vector<8x384xi1>, vector<8x384xf32>
    %160 = arith.addf %149, %159 : vector<8x384xf32>
    %c350_i32 = arith.constant 350 : i32
    %161 = tpu.dynamic_rotate %57 by %c350_i32 dim 1 : vector<8x384xf32>, i32 -> vector<8x384xf32>
    %cst_53 = arith.constant 1.000000e+01 : f32
    %162 = vector.broadcast %cst_53 : f32 to vector<1x384xf32>
    %163 = arith.cmpf olt, %71, %162 : vector<1x384xf32>
    %cst_54 = arith.constant 1.400000e+01 : f32
    %164 = vector.broadcast %cst_54 : f32 to vector<1x384xf32>
    %165 = arith.cmpf olt, %65, %164 : vector<1x384xf32>
    %166 = arith.andi %163, %165 : vector<1x384xi1>
    %c0_55 = arith.constant 0 : index
    %c48 = arith.constant 48 : index
    %167 = vector.load %arg1[%c0_55, %c48] : memref<16x49xf32, #tpu.memory_space<vmem>>, vector<8x1xf32>
    %168 = vector.broadcast %167 : vector<8x1xf32> to vector<8x384xf32>
    %169 = arith.mulf %161, %168 : vector<8x384xf32>
    %cst_56 = arith.constant 0.000000e+00 : f32
    %170 = vector.shape_cast %166 : vector<1x384xi1> to vector<1x384xi1>
    %171 = vector.broadcast %170 : vector<1x384xi1> to vector<8x384xi1>
    %172 = vector.broadcast %cst_56 : f32 to vector<8x384xf32>
    %173 = arith.select %171, %169, %172 : vector<8x384xi1>, vector<8x384xf32>
    %174 = arith.addf %160, %173 : vector<8x384xf32>
    %cst_57 = arith.constant dense<0.000000e+00> : vector<8x1xf32>
    %175 = tpu.matmul %174, %0, %cst_57 {dimension_numbers = #tpu.dot_dimension_numbers<[1], [0], [0], [1], [0, 0, 1, 1], [], []>} : vector<8x384xf32>, vector<384x1xf32>, vector<8x1xf32> -> vector<8x1xf32>
    %cst_58 = arith.constant 0.00260416674 : f32
    %176 = vector.broadcast %cst_58 : f32 to vector<8x1xf32>
    %177 = arith.mulf %175, %176 : vector<8x1xf32>
    %178 = vector.broadcast %177 : vector<8x1xf32> to vector<8x384xf32>
    %179 = arith.subf %174, %178 : vector<8x384xf32>
    %180 = arith.mulf %179, %179 : vector<8x384xf32>
    %cst_59 = arith.constant dense<0.000000e+00> : vector<8x1xf32>
    %181 = tpu.matmul %180, %0, %cst_59 {dimension_numbers = #tpu.dot_dimension_numbers<[1], [0], [0], [1], [0, 0, 1, 1], [], []>} : vector<8x384xf32>, vector<384x1xf32>, vector<8x1xf32> -> vector<8x1xf32>
    %cst_60 = arith.constant 0.00260416674 : f32
    %182 = vector.broadcast %cst_60 : f32 to vector<8x1xf32>
    %183 = arith.mulf %181, %182 : vector<8x1xf32>
    %cst_61 = arith.constant 9.99999974E-6 : f32
    %184 = vector.broadcast %cst_61 : f32 to vector<8x1xf32>
    %185 = arith.addf %183, %184 : vector<8x1xf32>
    %186 = math.rsqrt %185 : vector<8x1xf32>
    %c0_62 = arith.constant 0 : index
    %c5 = arith.constant 5 : index
    %187 = vector.load %arg1[%c0_62, %c5] : memref<16x49xf32, #tpu.memory_space<vmem>>, vector<8x1xf32>
    %188 = arith.mulf %186, %187 : vector<8x1xf32>
    %c0_63 = arith.constant 0 : index
    %c24 = arith.constant 24 : index
    %189 = vector.load %arg1[%c0_63, %c24] : memref<16x49xf32, #tpu.memory_space<vmem>>, vector<8x16xf32>
    %190 = vector.broadcast %188 : vector<8x1xf32> to vector<8x16xf32>
    %191 = arith.mulf %189, %190 : vector<8x16xf32>
    %cst_64 = arith.constant dense<0.000000e+00> : vector<16x384xf32>
    %192 = tpu.matmul %191, %179, %cst_64 {dimension_numbers = #tpu.dot_dimension_numbers<[0], [0], [1], [1], [0, 1, 1, 1], [], []>} : vector<8x16xf32>, vector<8x384xf32>, vector<16x384xf32> -> vector<16x384xf32>
    %c0_65 = arith.constant 0 : index
    %c6 = arith.constant 6 : index
    %193 = vector.load %arg1[%c0_65, %c6] : memref<16x49xf32, #tpu.memory_space<vmem>>, vector<8x1xf32>
    %cst_66 = arith.constant dense<0.000000e+00> : vector<16x1xf32>
    %194 = tpu.matmul %189, %193, %cst_66 {dimension_numbers = #tpu.dot_dimension_numbers<[0], [0], [1], [1], [0, 1, 1, 1], [], []>} : vector<8x16xf32>, vector<8x1xf32>, vector<16x1xf32> -> vector<16x1xf32>
    %c0_67 = arith.constant 0 : index
    %c2 = arith.constant 2 : index
    %195 = vector.load %arg1[%c0_67, %c2] : memref<16x49xf32, #tpu.memory_space<vmem>>, vector<16x1xf32>
    %196 = arith.addf %194, %195 : vector<16x1xf32>
    %197 = vector.broadcast %196 : vector<16x1xf32> to vector<16x384xf32>
    %198 = arith.addf %192, %197 : vector<16x384xf32>
    %199 = arith.addf %198, %1 : vector<16x384xf32>
    %c0_68 = arith.constant 0 : index
    %c0_69 = arith.constant 0 : index
    %200 = vector.load %arg2[%c0_68, %c0_69] : memref<16x384xf32, #tpu.memory_space<vmem>>, vector<16x384xf32>
    tpu.vector_store %arg2[%c0_68, %c0_69], %199 {strides = array<i32>} : memref<16x384xf32, #tpu.memory_space<vmem>>, vector<16x384xf32>,
    return
  }
}

</mosaic_0001>

<bundles_post_ra>
// kernel: resnet_block.1
= control target key start
LH: loop header
LB: loop body
LE: loop exit
PB: predicated region body
PF: predicated region fallthrough
CT: control target
= control target key end

     0   :  { %7 = vsyncpa [#allocation3], 0  ;;  %s3534_s0 = inlined_call_operand.hbm [shape: f32[16,384], index: 0, kind: input, shape index: {}, may-alias: {0,2}]   ;;  %s3535_s1 = inlined_call_operand.hbm [shape: f32[16,49], index: 1, kind: input, shape index: {}]   ;;  %s3536_s2 = inlined_call_operand.hbm [shape: f32[16,384], index: 2, kind: output, shape index: {}, may-alias: {0,2}]  }
   0x1   :  { %8 = vsyncpa [#allocation6], 0 }
   0x2   :  { %9 = vsyncpa [#allocation4], 0  ;;  %s2819_s9 = smov [#allocation2]   ;;  %s2747_s13 = scalar_lea.hbm %s3534_s0, 768 }
   0x3   :  { %s15_s10 = sshll.u32 %s2819_s9, 4  ;;  %p2748_p0 = scmp.ne.s32.totalorder %s3534_s0, %s2747_s13  ;;  %s16_s10 = int_to_ptr.vmem [resolvable:$true] %s15_s10 }
   0x4   :  { %p2751_p1 = scmp.lt.u32.totalorder %s2747_s13, %s3534_s0 }
   0x6   :  { %p2753_p2 = pnand %p2751_p1, %p2748_p0 }
   0x8   :  { %2756 = shalt.err (!%p2753_p2)
}
   0x9   :  { %s2757_s18 = scalar_lea.vmem %s16_s10, 768  ;;  %p2762_p4 = scmp.lt.s32.totalorder %s16_s10, %s16_s10 }
   0xa   :  { %p2758_p3 = scmp.ne.s32.totalorder %s16_s10, %s2757_s18  ;;  %p2763_p5 = scmp.lt.s32.totalorder %s2757_s18, %s2757_s18 }
   0xc   :  { %p2764_p6 = por %p2763_p5, %p2762_p4 }
   0xe   :  { %p2765_p7 = pnand %p2764_p6, %p2758_p3 }
  0x10   :  { %2768 = shalt.err (!%p2765_p7)
}
  0x11   :  { %s2820_s19 = smov 384   ;;  %s2821_s20 = smov 24  }
  0x12   :  { %21 = dma.hbm_to_vmem [thread:$0]  %s3534_s0, 768, %s16_s10, [#allocation3], %s2820_s19, %s2820_s19, %s2821_s20  }
  0x13   :  { %s2822_s23 = smov [#allocation5]   ;;  %s2769_s27 = scalar_lea.hbm %s3535_s1, 256 }
  0x14   :  { %s27_s24 = sshll.u32 %s2822_s23, 4  ;;  %p2770_p8 = scmp.ne.s32.totalorder %s3535_s1, %s2769_s27  ;;  %s28_s24 = int_to_ptr.vmem [resolvable:$true] %s27_s24 }
  0x15   :  { %p2773_p9 = scmp.lt.u32.totalorder %s2769_s27, %s3535_s1 }
  0x17   :  { %p2775_p10 = pnand %p2773_p9, %p2770_p8 }
  0x19   :  { %2778 = shalt.err (!%p2775_p10)
}
  0x1a   :  { %s2779_s4 = scalar_lea.vmem %s28_s24, 256  ;;  %p2784_p12 = scmp.lt.s32.totalorder %s28_s24, %s28_s24 }
  0x1b   :  { %p2780_p11 = scmp.ne.s32.totalorder %s28_s24, %s2779_s4  ;;  %p2785_p13 = scmp.lt.s32.totalorder %s2779_s4, %s2779_s4 }
  0x1d   :  { %p2786_p0 = por %p2785_p13, %p2784_p12 }
  0x1f   :  { %p2787_p1 = pnand %p2786_p0, %p2780_p11 }
  0x21   :  { %2790 = shalt.err (!%p2787_p1)
}
  0x22   :  { %s2823_s0 = smov 128   ;;  %s2824_s5 = smov 8  }
  0x23   :  { %33 = dma.hbm_to_vmem [thread:$0]  %s3535_s1, 256, %s28_s24, [#allocation6], %s2823_s0, %s2823_s0, %s2824_s5  }
  0x24   :  { %2813 = dma.done.wait [#allocation3], 768  }
  0x25   :  { %2814 = vsyncadd [#allocation3], 4294966528 }
  0x26   :  { %2815 = dma.done.wait [#allocation6], 256  }
  0x27   :  { %2816 = vsyncadd [#allocation6], 4294967040  ;;  %v2825_v0 = vmov 1.0|1.0   ;;  %v2907_v1 = vld [vmem:[#allocation2 + $0x8] sm:$0xff]  ;;  %v2909_v2 = vld [vmem:[#allocation2 + $0x10] sm:$0xff] }
  0x28   :  { %2460 = vmatprep.subr.bf16.mxu0 %v2825_v0  ;;  %2476 = vmatprep.subr.bf16.mxu1 %v2825_v0  ;;  %v40_v3 = vld [vmem:[#allocation2] sm:$0xff]  ;;  %v2935_v4 = vld [vmem:[#allocation2 + $0x28] sm:$0xff]  ;;  %v43_v6 = vld [vmem:[#allocation2 + $0x18] sm:$0xff]  ;;  %v2826_v7 = vmov 0   ;;  %v2827_v35 = vmov 1   ;;  %s2828_s1 = smov 120  }
  0x29   :  { %2461 = vmatpush3.bf16.msra.mxu0 %v2825_v0  ;;  %2477 = vmatpush3.bf16.msra.mxu1 %v2825_v0  ;;  %v2937_v5 = vld [vmem:[#allocation2 + $0x20] sm:$0xff]  ;;  %v2991_v34 = vld [vmem:[#allocation5] sm:$0xff]  ;;  %v373_v52 = vld [vmem:[#allocation5 + $0x8] sm:$0xff]  ;;  %v2829_v55 = vmov 0.0|0.0   ;;  %v2830_v56 = vmov 0.0   ;;  %vm3537_vm0 = vmmov 0  }
  0x2a   :  { %2462 = vmatprep.subr.bf16.mxu0 %v2825_v0  ;;  %2478 = vmatprep.subr.bf16.mxu1 %v2825_v0  ;;  %vm452_vm7 = vcmask 130048   ;;  %s2832_s8 = smov 125   ;;  %s2843_s9 = smov 34  }
  0x2b   :  { %110 = vmatprep.mubr.f32.mxu0 %v2907_v1  ;;  %2265 = vmatprep.mubr.f32.mxu1 %v2909_v2  ;;  %s2844_s10 = smov 32   ;;  %s2845_s11 = smov 30  }
  0x2c   :  { %2695 = vset.pattern.permute.xlu0 %v2826_v7  ;;  %2697 = vset.pattern.permute.xlu1 %v2826_v7  ;;  %s2846_s12 = smov 2   ;;  %s2847_s13 = smov 126  }
  0x2d   :  { %2463 = vmatpush3.bf16.msra.mxu0 %v2825_v0  ;;  %2479 = vmatpush3.bf16.msra.mxu1 %v2825_v0  ;;  %s2848_s14 = smov 98   ;;  %s2849_s15 = smov 96  }
  0x2e   :  { %2464 = vmatprep.subr.bf16.mxu0 %v2825_v0  ;;  %2480 = vmatprep.subr.bf16.mxu1 %v2825_v0  ;;  %s2850_s16 = smov 94   ;;  %s2851_s17 = smov 123  }
  0x2f   :  { %s2852_s18 = smov 104   ;;  %s2853_s21 = smov 122  }
  0x30   :  { %s2854_s22 = smov [#allocation7]  }
  0x31   :  { %2465 = vmatpush3.bf16.msra.mxu0 %v2825_v0  ;;  %2481 = vmatpush3.bf16.msra.mxu1 %v2825_v0  ;;  %s1874_s23 = sshll.u32 %s2854_s22, 4  ;;  %s1875_s23 = int_to_ptr.vmem [resolvable:$true] %s1874_s23 }
  0x32   :  { %2466 = vmatprep.subr.bf16.mxu0 %v2825_v0  ;;  %2482 = vmatprep.subr.bf16.mxu1 %v2825_v0  ;;  %s2791_s24 = scalar_lea.vmem %s1875_s23, 768  ;;  %p2796_p3 = scmp.lt.s32.totalorder %s1875_s23, %s1875_s23 }
  0x33   :  { %p2792_p2 = scmp.ne.s32.totalorder %s1875_s23, %s2791_s24  ;;  %p2797_p4 = scmp.lt.s32.totalorder %s2791_s24, %s2791_s24 }
  0x35   :  { %2467 = vmatpush3.bf16.msra.mxu0 %v2825_v0  ;;  %2483 = vmatpush3.bf16.msra.mxu1 %v2825_v0  ;;  %p2798_p5 = por %p2797_p4, %p2796_p3 }
  0x36   :  { %2468 = vmatprep.subr.bf16.mxu0 %v2825_v0  ;;  %2484 = vmatprep.subr.bf16.mxu1 %v2825_v0 }
  0x37   :  { %p2799_p6 = pnand %p2798_p5, %p2792_p2 }
  0x39   :  { %2469 = vmatpush3.bf16.msra.mxu0 %v2825_v0  ;;  %2485 = vmatpush3.bf16.msra.mxu1 %v2825_v0 }
  0x3a   :  { %2470 = vmatprep.subr.bf16.mxu0 %v2825_v0  ;;  %2486 = vmatprep.subr.bf16.mxu1 %v2825_v0 }
  0x3d   :  { %2471 = vmatpush3.bf16.msra.mxu0 %v2825_v0  ;;  %2487 = vmatpush3.bf16.msra.mxu1 %v2825_v0 }
  0x3e   :  { %2472 = vmatprep.subr.bf16.mxu0 %v2825_v0  ;;  %2488 = vmatprep.subr.bf16.mxu1 %v2825_v0 }
  0x41   :  { %2473 = vmatpush3.bf16.msra.mxu0 %v2825_v0  ;;  %2489 = vmatpush3.bf16.msra.mxu1 %v2825_v0 }
  0x42   :  { %2474 = vmatprep.subr.bf16.mxu0 %v2825_v0  ;;  %2490 = vmatprep.subr.bf16.mxu1 %v2825_v0 }
  0x45   :  { %2475 = vmatpush3.bf16.msra.mxu0 %v2825_v0  ;;  %2491 = vmatpush3.bf16.msra.mxu1 %v2825_v0 }
  0x46   :  { %2492 = vmatprep.subr.bf16.mxu0 %v2825_v0  ;;  %2508 = vmatprep.subr.bf16.mxu1 %v2825_v0 }
  0x48   :  { %111 = vmatmul.mubr.f32.vlgmr.msra.gmra.mrb[0].mxu0 %v40_v3  ;;  %2266 = vmatmul.mubr.f32.vlgmr.msra.gmra.mrb[0].mxu1 %v2935_v4 }
  0x49   :  { %115 = vmatprep.mubr.f32.mxu0 %v2937_v5  ;;  %2493 = vmatpush3.bf16.msra.mxu0 %v2825_v0 }
  0x4a   :  { %2494 = vmatprep.subr.bf16.mxu0 %v2825_v0  ;;  %2509 = vmatpush3.bf16.msra.mxu1 %v2825_v0 }
  0x4b   :  { %2510 = vmatprep.subr.bf16.mxu1 %v2825_v0 }
  0x4c   :  { %116 = vmatmul.mubr.f32.gmra.mrb[2].mxu0 %v43_v6 }
  0x4d   :  { %2495 = vmatpush3.bf16.msra.mxu0 %v2825_v0 }
  0x4e   :  { %2496 = vmatprep.subr.bf16.mxu0 %v2825_v0  ;;  %2511 = vmatpush3.bf16.msra.mxu1 %v2825_v0 }
  0x4f   :  { %2512 = vmatprep.subr.bf16.mxu1 %v2825_v0 }
  0x51   :  { %2497 = vmatpush3.bf16.msra.mxu0 %v2825_v0 }
  0x52   :  { %2498 = vmatprep.subr.bf16.mxu0 %v2825_v0  ;;  %2513 = vmatpush3.bf16.msra.mxu1 %v2825_v0 }
  0x53   :  { %2514 = vmatprep.subr.bf16.mxu1 %v2825_v0 }
  0x55   :  { %2499 = vmatpush3.bf16.msra.mxu0 %v2825_v0 }
  0x56   :  { %2500 = vmatprep.subr.bf16.mxu0 %v2825_v0  ;;  %2515 = vmatpush3.bf16.msra.mxu1 %v2825_v0 }
  0x57   :  { %2516 = vmatprep.subr.bf16.mxu1 %v2825_v0 }
  0x59   :  { %2501 = vmatpush3.bf16.msra.mxu0 %v2825_v0 }
  0x5a   :  { %2502 = vmatprep.subr.bf16.mxu0 %v2825_v0  ;;  %2517 = vmatpush3.bf16.msra.mxu1 %v2825_v0 }
  0x5b   :  { %2518 = vmatprep.subr.bf16.mxu1 %v2825_v0 }
  0x5d   :  { %2503 = vmatpush3.bf16.msra.mxu0 %v2825_v0 }
  0x5e   :  { %2504 = vmatprep.subr.bf16.mxu0 %v2825_v0  ;;  %2519 = vmatpush3.bf16.msra.mxu1 %v2825_v0 }
  0x5f   :  { %2520 = vmatprep.subr.bf16.mxu1 %v2825_v0 }
  0x61   :  { %2505 = vmatpush3.bf16.msra.mxu0 %v2825_v0 }
  0x62   :  { %2506 = vmatprep.subr.bf16.mxu0 %v2825_v0  ;;  %2521 = vmatpush3.bf16.msra.mxu1 %v2825_v0 }
  0x63   :  { %2522 = vmatprep.subr.bf16.mxu1 %v2825_v0 }
  0x65   :  { %2507 = vmatpush3.bf16.msra.mxu0 %v2825_v0 }
  0x66   :  { %2523 = vmatpush3.bf16.msra.mxu1 %v2825_v0  ;;  %2528 = vmatprep.subr.bf16.mxu0 %v2829_v55 }
 0x11b   :  { %v1936_v8 = vpop.f32.mrb[0].mxu0  ;;  %v2267_v9 = vpop.f32.mrb[0].mxu1 }
 0x11c   :  { %v1937_v10 = vpop.f32.mrb[1].mxu0  ;;  %v187_v11 = vpop.f32.mrb[1].mxu1 }
 0x11d   :  { %v1938_v12 = vadd.f32 %v1937_v10, %v1936_v8 }
 0x11f   :  { %v188_v13 = vadd.f32 %v1938_v12, %v187_v11  ;;  %v1939_v14 = vpop.f32.mrb[2].mxu0 }
 0x120   :  { %v1940_v15 = vpop.f32.mrb[3].mxu0 }
 0x121   :  { %v196_v16 = vmul.f32 0.0026041667, %v188_v13  ;;  %v1941_v17 = vadd.f32 %v1940_v15, %v1939_v14 }
 0x123   :  { %v193_v18 = vadd.f32 %v2267_v9, %v1941_v17  ;;  %200 = vperm.xlu0 %2695, %v196_v16  }
 0x125   :  { %v197_v19 = vmul.f32 0.0026041667, %v193_v18 }
 0x127   :  { %205 = vperm.xlu0 %2695, %v197_v19  }
 0x12b   :  { %2696 = vset.pattern.permute.xlu0 %v2827_v35 }
 0x12c   :  { %398 = vperm.xlu0 %2696, %v2991_v34  }
 0x130   :  { %2699 = vset.pattern.permute.xlu0 %v2826_v7 }
 0x1a2   :  { %v201_v20 = vpop.permute.xlu0 %200 }
 0x1a3   :  { %v208_v21 = vsub.f32 %v40_v3, %v201_v20  ;;  %v209_v22 = vsub.f32 %v2907_v1, %v201_v20  ;;  %v210_v23 = vsub.f32 %v2909_v2, %v201_v20 }
 0x1a5   :  { %v214_v24 = vmul.f32 %v208_v21, %v208_v21  ;;  %v215_v25 = vmul.f32 %v209_v22, %v209_v22  ;;  %v216_v26 = vmul.f32 %v210_v23, %v210_v23 }
 0x1a6   :  { %v206_v27 = vpop.permute.xlu0 %205 }
 0x1a7   :  { %v2977_v28 = vsub.f32 %v43_v6, %v206_v27  ;;  %v2980_v29 = vsub.f32 %v2937_v5, %v206_v27  ;;  %v2983_v30 = vsub.f32 %v2935_v4, %v206_v27  ;;  %284 = vmatprep.mubr.f32.mxu0 %v215_v25  ;;  %2300 = vmatprep.mubr.f32.mxu1 %v216_v26 }
 0x1a8   :  { %285 = vmatmul.mubr.f32.vlgmr.msra.gmra.mrb[4].mxu0 %v214_v24 }
 0x1a9   :  { %v219_v31 = vmul.f32 %v2983_v30, %v2983_v30  ;;  %v218_v32 = vmul.f32 %v2980_v29, %v2980_v29  ;;  %v217_v33 = vmul.f32 %v2977_v28, %v2977_v28 }
 0x1ab   :  { %289 = vmatprep.mubr.f32.mxu0 %v218_v32  ;;  %2301 = vmatmul.mubr.f32.vlgmr.msra.gmra.mrb[2].mxu1 %v219_v31  ;;  %v399_v58 = vpop.permute.xlu0 %398 }
 0x1ac   :  { %290 = vmatmul.mubr.f32.gmra.mrb[6].mxu0 %v217_v33  ;;  %519 = vmatprep.mubr.f32.mxu1 %v2830_v56 }
 0x1ad   :  { %2307 = vmatprep.mubr.msk.f32.mxu0 %vm3537_vm0, %v2830_v56 }
 0x27b   :  { %v1992_v36 = vpop.f32.mrb[4].mxu0 }
 0x27c   :  { %v1993_v37 = vpop.f32.mrb[5].mxu0 }
 0x27d   :  { %v1994_v38 = vadd.f32 %v1993_v37, %v1992_v36 }
 0x27e   :  { %v2302_v39 = vpop.f32.mrb[2].mxu1 }
 0x27f   :  { %v1995_v40 = vpop.f32.mrb[6].mxu0  ;;  %v361_v41 = vpop.f32.mrb[3].mxu1 }
 0x280   :  { %v362_v42 = vadd.f32 %v1994_v38, %v361_v41  ;;  %v1996_v43 = vpop.f32.mrb[7].mxu0 }
 0x281   :  { %v1997_v44 = vadd.f32 %v1996_v43, %v1995_v40 }
 0x282   :  { %v370_v45 = vmul.f32 0.0026041667, %v362_v42 }
 0x283   :  { %v367_v46 = vadd.f32 %v2302_v39, %v1997_v44 }
 0x284   :  { %v374_v47 = vadd.f32 1e-05, %v370_v45 }
 0x285   :  { %v371_v48 = vmul.f32 0.0026041667, %v367_v46 }
 0x286   :  { %2713 = vrsqrt.f32 %v374_v47 }
 0x287   :  { %v375_v49 = vadd.f32 1e-05, %v371_v48 }
 0x289   :  { %2715 = vrsqrt.f32 %v375_v49 }
 0x290   :  { %v2714_v50 = vpop.eup %2713 }
 0x291   :  { %v378_v51 = vmul.f32 %v2714_v50, %v2991_v34 }
 0x293   :  { %v2716_v53 = vpop.eup %2715  ;;  %382 = vperm.xlu1 %2697, %v378_v51  }
 0x294   :  { %v379_v54 = vmul.f32 %v2716_v53, %v373_v52 }
 0x297   :  { %387 = vperm.xlu1 %2697, %v379_v54  }
 0x29b   :  { %2698 = vset.pattern.permute.xlu1 %v2827_v35 }
 0x29c   :  { %403 = vperm.xlu1 %2698, %v373_v52  }
 0x2a0   :  { %450 = vrot.lane.b32.xlu1 %v2991_v34, %s2828_s1 }
 0x2a1   :  { %2700 = vset.pattern.permute.xlu1 %v2826_v7 }
 0x2a4   :  { %891 = vrot.lane.b32.xlu1 %v2991_v34, %s2832_s8 }
 0x312   :  { %v383_v57 = vpop.permute.xlu1 %382 }
 0x313   :  { %v390_v59 = vmul.f32 %v383_v57, %v208_v21  ;;  %v391_v60 = vmul.f32 %v383_v57, %v209_v22  ;;  %v392_v61 = vmul.f32 %v383_v57, %v210_v23 }
 0x315   :  { %v406_v62 = vadd.f32 %v399_v58, %v390_v59  ;;  %v407_v63 = vadd.f32 %v399_v58, %v391_v60  ;;  %v408_v1 = vadd.f32 %v399_v58, %v392_v61 }
 0x316   :  { %v388_v2 = vpop.permute.xlu1 %387 }
 0x317   :  { %v418_v3 = vmin.f32 %v406_v62, 0.0  ;;  %v419_v4 = vmin.f32 %v407_v63, 0.0  ;;  %v420_v5 = vmin.f32 %v408_v1, 0.0  ;;  %v393_v8 = vmul.f32 %v388_v2, %v2977_v28 }
 0x318   :  { %v394_v9 = vmul.f32 %v388_v2, %v2980_v29  ;;  %v395_v10 = vmul.f32 %v388_v2, %v2983_v30  ;;  %vm412_vm1 = vcmp.gt.f32.partialorder %v406_v62, 0.0  ;;  %vm414_vm2 = vcmp.gt.f32.partialorder %v408_v1, 0.0 }
 0x319   :  { %v424_v6 = vmul.f32 1.442695, %v418_v3  ;;  %v426_v11 = vmul.f32 1.442695, %v419_v4  ;;  %v428_v13 = vmul.f32 1.442695, %v420_v5 }
 0x31a   :  { %vm413_vm4 = vcmp.gt.f32.partialorder %v407_v63, 0.0  ;;  %v2833_v3 = vmov 4  }
 0x31b   :  { %v404_v12 = vpop.permute.xlu1 %403  ;;  %2717 = vpow2.f32 %v424_v6 }
 0x31c   :  { %v409_v14 = vadd.f32 %v404_v12, %v393_v8  ;;  %v410_v15 = vadd.f32 %v404_v12, %v394_v9  ;;  %v411_v16 = vadd.f32 %v404_v12, %v395_v10  ;;  %2719 = vpow2.f32 %v426_v11 }
 0x31d   :  { %2721 = vpow2.f32 %v428_v13 }
 0x31e   :  { %v421_v17 = vmin.f32 %v409_v14, 0.0  ;;  %v422_v18 = vmin.f32 %v410_v15, 0.0  ;;  %v423_v19 = vmin.f32 %v411_v16, 0.0  ;;  %vm415_vm3 = vcmp.gt.f32.partialorder %v409_v14, 0.0 }
 0x31f   :  { %vm416_vm5 = vcmp.gt.f32.partialorder %v410_v15, 0.0  ;;  %vm417_vm6 = vcmp.gt.f32.partialorder %v411_v16, 0.0  ;;  %v451_v45 = vpop.permute.xlu1 %450 }
 0x320   :  { %v430_v20 = vmul.f32 1.442695, %v421_v17  ;;  %v432_v21 = vmul.f32 1.442695, %v422_v18  ;;  %v434_v22 = vmul.f32 1.442695, %v423_v19 }
 0x321   :  { %v2835_v17 = vmov 41   ;;  %v2836_v18 = vmov 44   ;;  %v2837_v19 = vmov 42  }
 0x322   :  { %2723 = vpow2.f32 %v430_v20  ;;  %v2838_v20 = vmov 43  }
 0x323   :  { %2725 = vpow2.f32 %v432_v21  ;;  %v892_v13 = vpop.permute.xlu1 %891  ;;  %v2839_v21 = vmov 45  }
 0x324   :  { %2727 = vpow2.f32 %v434_v22  ;;  %v2840_v22 = vmov 46  }
 0x325   :  { %v2718_v23 = vpop.eup %2717 }
 0x326   :  { %v2720_v24 = vpop.eup %2719  ;;  %v1887_v26 = vadd.f32 -1.0, %v2718_v23  ;;  %v2841_v23 = vmov 47  }
 0x327   :  { %v2722_v25 = vpop.eup %2721  ;;  %v1888_v28 = vadd.f32 -1.0, %v2720_v24  ;;  %v2842_v24 = vmov 48  }
 0x328   :  { %v1889_v30 = vadd.f32 -1.0, %v2722_v25  ;;  %v442_v35 = vsel %vm412_vm1, %v406_v62, %v1887_v26 }
 0x329   :  { %v443_v38 = vsel %vm413_vm4, %v407_v63, %v1888_v28 }
 0x32a   :  { %v444_v41 = vsel %vm414_vm2, %v408_v1, %v1889_v30 }
 0x32c   :  { %v2724_v27 = vpop.eup %2723 }
 0x32d   :  { %v2726_v29 = vpop.eup %2725  ;;  %v1890_v31 = vadd.f32 -1.0, %v2724_v27 }
 0x32e   :  { %v2728_v32 = vpop.eup %2727  ;;  %v1891_v33 = vadd.f32 -1.0, %v2726_v29 }
 0x32f   :  { %v1892_v36 = vadd.f32 -1.0, %v2728_v32  ;;  %v445_v37 = vsel %vm415_vm3, %v409_v14, %v1890_v31 }
 0x330   :  { %v446_v39 = vsel %vm416_vm5, %v410_v15, %v1891_v33  ;;  %v2526_v40 = vpack.c.bf16 %v445_v37, %v442_v35 }
 0x331   :  { %v447_v42 = vsel %vm417_vm6, %v411_v16, %v1892_v36  ;;  %v2524_v43 = vpack.c.bf16 %v446_v39, %v443_v38  ;;  %v2834_v16 = vmov 40  }
 0x332   :  { %v2529_v44 = vpack.c.bf16 %v447_v42, %v444_v41 }
 0x333   :  { %2525 = vmatprep.subr.bf16.mxu1 %v2524_v43 }
 0x334   :  { %2530 = vmatpush3.bf16.msra.mxu0 %v2529_v44  ;;  %2527 = vmatpush1.bf16.msra.mxu1 %v2526_v40 }
 0x335   :  { %2547 = vmatprep.subr.bf16.mxu0 %v2829_v55  ;;  %2531 = vmatprep.subr.bf16.mxu1 %v2825_v0 }
 0x337   :  { %1893 = vmatmul.mubr.msk.f32.vlgmr.msra.gmra.mrb[4].mxu1 %vm452_vm7, %v451_v45  ;;  %2308 = vmatmul.mubr.msk.f32.vlgmr.msra.gmra.mrb[8].mxu0 %vm452_vm7, %v451_v45 }
 0x338   :  { %2548 = vmatpush3.bf16.msra.mxu0 %v2825_v0  ;;  %2532 = vmatpush3.bf16.msra.mxu1 %v2825_v0 }
 0x339   :  { %2549 = vmatprep.subr.bf16.mxu0 %v2829_v55  ;;  %2533 = vmatprep.subr.bf16.mxu1 %v2825_v0 }
 0x33a   :  { %2342 = vmatprep.mubr.msk.f32.mxu0 %vm3537_vm0, %v2830_v56 }
 0x33c   :  { %2550 = vmatpush3.bf16.msra.mxu0 %v2825_v0  ;;  %2534 = vmatpush3.bf16.msra.mxu1 %v2825_v0 }
 0x33d   :  { %2551 = vmatprep.subr.bf16.mxu0 %v2829_v55  ;;  %2535 = vmatprep.subr.bf16.mxu1 %v2825_v0 }
 0x340   :  { %2552 = vmatpush3.bf16.msra.mxu0 %v2825_v0  ;;  %2536 = vmatpush3.bf16.msra.mxu1 %v2825_v0 }
 0x341   :  { %2553 = vmatprep.subr.bf16.mxu0 %v2829_v55  ;;  %2537 = vmatprep.subr.bf16.mxu1 %v2825_v0 }
 0x344   :  { %2554 = vmatpush3.bf16.msra.mxu0 %v2825_v0  ;;  %2538 = vmatpush3.bf16.msra.mxu1 %v2825_v0 }
 0x345   :  { %2555 = vmatprep.subr.bf16.mxu0 %v2829_v55  ;;  %2539 = vmatprep.subr.bf16.mxu1 %v2825_v0 }
 0x348   :  { %2556 = vmatpush3.bf16.msra.mxu0 %v2825_v0  ;;  %2540 = vmatpush3.bf16.msra.mxu1 %v2825_v0 }
 0x349   :  { %2557 = vmatprep.subr.bf16.mxu0 %v2829_v55  ;;  %2541 = vmatprep.subr.bf16.mxu1 %v2825_v0 }
 0x34c   :  { %2558 = vmatpush3.bf16.msra.mxu0 %v2825_v0  ;;  %2542 = vmatpush3.bf16.msra.mxu1 %v2825_v0 }
 0x34d   :  { %2559 = vmatprep.subr.bf16.mxu0 %v2829_v55  ;;  %2543 = vmatprep.subr.bf16.mxu1 %v2825_v0 }
 0x350   :  { %2560 = vmatpush3.bf16.msra.mxu0 %v2825_v0  ;;  %2544 = vmatpush3.bf16.msra.mxu1 %v2825_v0 }
 0x351   :  { %2561 = vmatprep.subr.bf16.mxu0 %v2829_v55  ;;  %2545 = vmatprep.subr.bf16.mxu1 %v2825_v0 }
 0x354   :  { %2562 = vmatpush3.bf16.msra.mxu0 %v2825_v0  ;;  %2546 = vmatpush3.bf16.msra.mxu1 %v2825_v0 }
 0x355   :  { %2579 = vmatprep.subr.bf16.mxu0 %v2829_v55  ;;  %2563 = vmatprep.subr.bf16.mxu1 %v2825_v0 }
 0x40a   :  { %v521_v46 = vpop.f32.mrb[4].mxu1  ;;  %v592_v47 = vpop.f32.mrb[8].mxu0 }
 0x40b   :  { %v523_v48 = vpop.f32.mrb[5].mxu1  ;;  %v2309_v49 = vpop.f32.mrb[9].mxu0  ;;  %2343 = vmatmul.mubr.f32.vlgmr.msra.gmra.mrb[10].mxu0 %v592_v47 }
 0x40c   :  { %660 = vmatprep.mubr.f32.mxu1 %v523_v48  ;;  %2580 = vmatpush3.bf16.msra.mxu0 %v2825_v0 }
 0x40d   :  { %661 = vmatmul.mubr.f32.vlgmr.msra.gmra.mrb[6].mxu1 %v521_v46  ;;  %2581 = vmatprep.subr.bf16.mxu0 %v2829_v55 }
 0x40e   :  { %2564 = vmatpush3.bf16.msra.mxu1 %v2825_v0  ;;  %2377 = vmatprep.mubr.msk.f32.mxu0 %vm3537_vm0, %v2830_v56 }
 0x40f   :  { %2565 = vmatprep.subr.bf16.mxu1 %v2825_v0 }
 0x410   :  { %2582 = vmatpush3.bf16.msra.mxu0 %v2825_v0 }
 0x411   :  { %2583 = vmatprep.subr.bf16.mxu0 %v2829_v55 }
 0x412   :  { %2566 = vmatpush3.bf16.msra.mxu1 %v2825_v0 }
 0x413   :  { %2567 = vmatprep.subr.bf16.mxu1 %v2825_v0 }
 0x414   :  { %2584 = vmatpush3.bf16.msra.mxu0 %v2825_v0 }
 0x415   :  { %2585 = vmatprep.subr.bf16.mxu0 %v2829_v55 }
 0x416   :  { %2568 = vmatpush3.bf16.msra.mxu1 %v2825_v0 }
 0x417   :  { %2569 = vmatprep.subr.bf16.mxu1 %v2825_v0 }
 0x418   :  { %2586 = vmatpush3.bf16.msra.mxu0 %v2825_v0 }
 0x419   :  { %2587 = vmatprep.subr.bf16.mxu0 %v2829_v55 }
 0x41a   :  { %2570 = vmatpush3.bf16.msra.mxu1 %v2825_v0 }
 0x41b   :  { %2571 = vmatprep.subr.bf16.mxu1 %v2825_v0 }
 0x41c   :  { %2588 = vmatpush3.bf16.msra.mxu0 %v2825_v0 }
 0x41d   :  { %2589 = vmatprep.subr.bf16.mxu0 %v2829_v55 }
 0x41e   :  { %2572 = vmatpush3.bf16.msra.mxu1 %v2825_v0 }
 0x41f   :  { %2573 = vmatprep.subr.bf16.mxu1 %v2825_v0 }
 0x420   :  { %2590 = vmatpush3.bf16.msra.mxu0 %v2825_v0 }
 0x421   :  { %2591 = vmatprep.subr.bf16.mxu0 %v2829_v55 }
 0x422   :  { %2574 = vmatpush3.bf16.msra.mxu1 %v2825_v0 }
 0x423   :  { %2575 = vmatprep.subr.bf16.mxu1 %v2825_v0 }
 0x424   :  { %2592 = vmatpush3.bf16.msra.mxu0 %v2825_v0 }
 0x425   :  { %2593 = vmatprep.subr.bf16.mxu0 %v2829_v55 }
 0x426   :  { %2576 = vmatpush3.bf16.msra.mxu1 %v2825_v0 }
 0x427   :  { %2577 = vmatprep.subr.bf16.mxu1 %v2825_v0 }
 0x428   :  { %2594 = vmatpush3.bf16.msra.mxu0 %v2825_v0 }
 0x429   :  { %2611 = vmatprep.subr.bf16.mxu0 %v2829_v55 }
 0x42a   :  { %2578 = vmatpush3.bf16.msra.mxu1 %v2825_v0 }
 0x42b   :  { %2595 = vmatprep.subr.bf16.mxu1 %v2825_v0 }
 0x4de   :  { %v732_v50 = vpop.f32.mrb[10].mxu0 }
 0x4df   :  { %v2344_v51 = vpop.f32.mrb[11].mxu0 }
 0x4e0   :  { %v2051_v52 = vpop.f32.mrb[6].mxu1 }
 0x4e1   :  { %v2052_v53 = vpop.f32.mrb[7].mxu1 }
 0x4e2   :  { %v2053_v54 = vadd.f32 %v2052_v53, %v2051_v52 }
 0x4e4   :  { %v733_v57 = vadd.f32 %v2053_v54, %v732_v50  ;;  %v928_v54 = vlaneseq }
 0x4e6   :  { %v736_v58 = vmul.f32 0.0026041667, %v733_v57  ;;  %v3184_v57 = vand.u32 127, %v928_v54 }
 0x4e8   :  { %739 = vperm.xlu0 %2699, %v736_v58   ;;  %vm972_vm11 = vcmp.lt.s32.totalorder %v3184_v57, 34  ;;  %vm1010_vm14 = vcmp.lt.s32.totalorder %v3184_v57, 32  ;;  %vm1039_vm5 = vcmp.lt.s32.totalorder %v3184_v57, 30 }
 0x4ec   :  { %2701 = vset.pattern.permute.xlu0 %v2833_v3 }
 0x4ed   :  { %904 = vperm.xlu0 %2701, %v2991_v34  }
 0x4f1   :  { %2704 = vset.pattern.permute.xlu0 %v2835_v17 }
 0x4f2   :  { %1015 = vperm.xlu0 %2704, %v2991_v34  }
 0x4f6   :  { %2711 = vset.pattern.permute.xlu0 %v2826_v7 }
 0x567   :  { %v740_v59 = vpop.permute.xlu0 %739 }
 0x568   :  { %v3076_v60 = vsub.f32 %v521_v46, %v740_v59  ;;  %v3078_v61 = vsub.f32 %v523_v48, %v740_v59  ;;  %v3080_v62 = vsub.f32 %v592_v47, %v740_v59 }
 0x56a   :  { %v745_v63 = vmul.f32 %v3076_v60, %v3076_v60  ;;  %v747_v1 = vmul.f32 %v3080_v62, %v3080_v62  ;;  %v746_v2 = vmul.f32 %v3078_v61, %v3078_v61 }
 0x56c   :  { %812 = vmatprep.mubr.f32.mxu1 %v746_v2  ;;  %2378 = vmatmul.mubr.f32.vlgmr.msra.gmra.mrb[12].mxu0 %v747_v1  ;;  %v905_v26 = vpop.permute.xlu0 %904  ;;  %v932_v2 = vcvt.s32.f32 %v3184_v57 }
 0x56d   :  { %813 = vmatmul.mubr.f32.vlgmr.msra.gmra.mrb[8].mxu1 %v745_v63  ;;  %2612 = vmatpush3.bf16.msra.mxu0 %v2825_v0 }
 0x56e   :  { %2596 = vmatpush3.bf16.msra.mxu1 %v2825_v0  ;;  %2613 = vmatprep.subr.bf16.mxu0 %v2829_v55 }
 0x56f   :  { %2597 = vmatprep.subr.bf16.mxu1 %v2825_v0  ;;  %2412 = vmatprep.mubr.msk.f32.mxu0 %vm3537_vm0, %v2830_v56  ;;  %vm1103_vm0 = vcmp.lt.s32.totalorder %v3184_v57, 126 }
 0x571   :  { %2614 = vmatpush3.bf16.msra.mxu0 %v2825_v0  ;;  %v3188_v59 = vpop.permute.xlu0 %1015 }
 0x572   :  { %2598 = vmatpush3.bf16.msra.mxu1 %v2825_v0  ;;  %2615 = vmatprep.subr.bf16.mxu0 %v2829_v55 }
 0x573   :  { %2599 = vmatprep.subr.bf16.mxu1 %v2825_v0 }
 0x575   :  { %2616 = vmatpush3.bf16.msra.mxu0 %v2825_v0 }
 0x576   :  { %2600 = vmatpush3.bf16.msra.mxu1 %v2825_v0  ;;  %2617 = vmatprep.subr.bf16.mxu0 %v2829_v55 }
 0x577   :  { %2601 = vmatprep.subr.bf16.mxu1 %v2825_v0 }
 0x579   :  { %2618 = vmatpush3.bf16.msra.mxu0 %v2825_v0 }
 0x57a   :  { %2602 = vmatpush3.bf16.msra.mxu1 %v2825_v0  ;;  %2619 = vmatprep.subr.bf16.mxu0 %v2829_v55 }
 0x57b   :  { %2603 = vmatprep.subr.bf16.mxu1 %v2825_v0 }
 0x57d   :  { %2620 = vmatpush3.bf16.msra.mxu0 %v2825_v0 }
 0x57e   :  { %2604 = vmatpush3.bf16.msra.mxu1 %v2825_v0  ;;  %2621 = vmatprep.subr.bf16.mxu0 %v2829_v55 }
 0x57f   :  { %2605 = vmatprep.subr.bf16.mxu1 %v2825_v0 }
 0x581   :  { %2622 = vmatpush3.bf16.msra.mxu0 %v2825_v0 }
 0x582   :  { %2606 = vmatpush3.bf16.msra.mxu1 %v2825_v0  ;;  %2623 = vmatprep.subr.bf16.mxu0 %v2829_v55 }
 0x583   :  { %2607 = vmatprep.subr.bf16.mxu1 %v2825_v0 }
 0x585   :  { %2624 = vmatpush3.bf16.msra.mxu0 %v2825_v0 }
 0x586   :  { %2608 = vmatpush3.bf16.msra.mxu1 %v2825_v0  ;;  %2625 = vmatprep.subr.bf16.mxu0 %v2829_v55 }
 0x587   :  { %2609 = vmatprep.subr.bf16.mxu1 %v2825_v0 }
 0x589   :  { %2626 = vmatpush3.bf16.msra.mxu0 %v2825_v0 }
 0x58a   :  { %2610 = vmatpush3.bf16.msra.mxu1 %v2825_v0  ;;  %2643 = vmatprep.subr.bf16.mxu0 %v2829_v55 }
 0x58b   :  { %2627 = vmatprep.subr.bf16.mxu1 %v2825_v0 }
 0x63f   :  { %v884_v4 = vpop.f32.mrb[12].mxu0 }
 0x640   :  { %v2103_v5 = vpop.f32.mrb[8].mxu1  ;;  %v2379_v6 = vpop.f32.mrb[13].mxu0 }
 0x641   :  { %v2104_v8 = vpop.f32.mrb[9].mxu1 }
 0x642   :  { %v2105_v9 = vadd.f32 %v2104_v8, %v2103_v5  ;;  %v935_v8 = vmul.f32 0.0625, %v932_v2 }
 0x644   :  { %v885_v10 = vadd.f32 %v2105_v9, %v884_v4 }
 0x646   :  { %v888_v11 = vmul.f32 0.0026041667, %v885_v10 }
 0x648   :  { %v889_v12 = vadd.f32 1e-05, %v888_v11 }
 0x64a   :  { %2729 = vrsqrt.f32 %v889_v12 }
 0x654   :  { %v2730_v14 = vpop.eup %2729 }
 0x655   :  { %v894_v15 = vmul.f32 %v2730_v14, %v892_v13  ;;  %v938_v13 = vfloor.f32 %v935_v8 }
 0x657   :  { %897 = vperm.xlu1 %2700, %v894_v15  }
 0x65b   :  { %2702 = vset.pattern.permute.xlu1 %v2834_v16 }
 0x65c   :  { %986 = vperm.xlu1 %2702, %v2991_v34  }
 0x660   :  { %2703 = vset.pattern.permute.xlu1 %v2836_v18  ;;  %v947_v18 = vmul.f32 0.083333336, %v938_v13 }
 0x661   :  { %960 = vperm.xlu1 %2703, %v2991_v34  }
 0x665   :  { %2705 = vset.pattern.permute.xlu1 %v2837_v19 }
 0x666   :  { %1050 = vperm.xlu1 %2705, %v2991_v34  }
 0x66a   :  { %2706 = vset.pattern.permute.xlu1 %v2838_v20 }
 0x66b   :  { %1079 = vperm.xlu1 %2706, %v2991_v34  }
 0x66f   :  { %2707 = vset.pattern.permute.xlu1 %v2839_v21 }
 0x670   :  { %1108 = vperm.xlu1 %2707, %v2991_v34  }
 0x674   :  { %2708 = vset.pattern.permute.xlu1 %v2840_v22 }
 0x675   :  { %1143 = vperm.xlu1 %2708, %v2991_v34  }
 0x679   :  { %2709 = vset.pattern.permute.xlu1 %v2841_v23  ;;  %v950_v23 = vfloor.f32 %v947_v18 }
 0x67a   :  { %1172 = vperm.xlu1 %2709, %v2991_v34  }
 0x67e   :  { %2710 = vset.pattern.permute.xlu1 %v2842_v24 }
 0x67f   :  { %1204 = vperm.xlu1 %2710, %v2991_v34  }
 0x683   :  { %2712 = vset.pattern.permute.xlu1 %v2826_v7 }
 0x6d6   :  { %v898_v25 = vpop.permute.xlu1 %897 }
 0x6d7   :  { %v900_v27 = vmul.f32 %v898_v25, %v3076_v60  ;;  %v901_v28 = vmul.f32 %v898_v25, %v3078_v61  ;;  %v902_v29 = vmul.f32 %v898_v25, %v3080_v62  ;;  %v930_v60 = vadd.s32 128, %v3184_v57 }
 0x6d8   :  { %v931_v61 = vadd.s32 256, %v3184_v57 }
 0x6d9   :  { %v907_v30 = vadd.f32 %v905_v26, %v900_v27  ;;  %v908_v31 = vadd.f32 %v905_v26, %v901_v28  ;;  %v909_v32 = vadd.f32 %v905_v26, %v902_v29  ;;  %v933_v63 = vcvt.s32.f32 %v930_v60 }
 0x6da   :  { %v934_v3 = vcvt.s32.f32 %v931_v61  ;;  %v941_v28 = vmul.f32 16.0, %v938_v13 }
 0x6db   :  { %v913_v33 = vmin.f32 %v907_v30, 0.0  ;;  %v914_v35 = vmin.f32 %v908_v31, 0.0  ;;  %v915_v36 = vmin.f32 %v909_v32, 0.0  ;;  %vm910_vm8 = vcmp.gt.f32.partialorder %v907_v30, 0.0  ;;  %v3170_v47 = vpop.permute.xlu1 %986 }
 0x6dc   :  { %vm911_vm9 = vcmp.gt.f32.partialorder %v908_v31, 0.0  ;;  %vm912_vm10 = vcmp.gt.f32.partialorder %v909_v32, 0.0  ;;  %v936_v4 = vmul.f32 0.0625, %v933_v63  ;;  %v937_v9 = vmul.f32 0.0625, %v934_v3 }
 0x6dd   :  { %v916_v37 = vmul.f32 1.442695, %v913_v33  ;;  %v918_v38 = vmul.f32 1.442695, %v914_v35  ;;  %v920_v39 = vmul.f32 1.442695, %v915_v36 }
 0x6de   :  { %v939_v10 = vfloor.f32 %v936_v4  ;;  %v940_v14 = vfloor.f32 %v937_v9 }
 0x6df   :  { %2731 = vpow2.f32 %v916_v37  ;;  %v3212_v37 = vsub.f32 %v932_v2, %v941_v28 }
 0x6e0   :  { %2733 = vpow2.f32 %v918_v38  ;;  %v3172_v48 = vpop.permute.xlu1 %960  ;;  %v948_v15 = vmul.f32 0.083333336, %v939_v10  ;;  %v949_v19 = vmul.f32 0.083333336, %v940_v14  ;;  %v942_v25 = vmul.f32 16.0, %v939_v10 }
 0x6e1   :  { %2735 = vpow2.f32 %v920_v39  ;;  %v943_v29 = vmul.f32 16.0, %v940_v14  ;;  %vm979_vm15 = vcmp.ge.f32.partialorder %v3212_v37, 2.0  ;;  %vm1043_vm7 = vcmp.lt.f32.partialorder %v3212_v37, 14.0 }
 0x6e2   :  { %v951_v20 = vfloor.f32 %v948_v15  ;;  %v952_v24 = vfloor.f32 %v949_v19  ;;  %v3205_v33 = vsub.f32 %v933_v63, %v942_v25 }
 0x6e3   :  { %v3214_v38 = vsub.f32 %v934_v3, %v943_v29 }
 0x6e4   :  { %v954_v26 = vmul.f32 12.0, %v951_v20  ;;  %vm3539_vm13 = vcmp.ge.f32.partialorder %v3205_v33, 2.0  ;;  %vm1044_vm6 = vcmp.lt.f32.partialorder %v3205_v33, 14.0 }
 0x6e5   :  { %v3174_v49 = vpop.permute.xlu1 %1050  ;;  %vm3538_vm1 = vcmp.ge.f32.partialorder %v3214_v38, 2.0 }
 0x6e6   :  { %v3207_v35 = vsub.f32 %v939_v10, %v954_v26 }
 0x6e8   :  { %vm977_vm12 = vcmp.ge.f32.partialorder %v3207_v35, 2.0 }
 0x6e9   :  { %v2732_v7 = vpop.eup %2731  ;;  %vm3236_vm2 = vmand %vm977_vm12, %vm3539_vm13  ;;  %vm1167_vm13 = vcmp.lt.s32.totalorder %v3184_v57, 96 }
 0x6ea   :  { %v2734_v34 = vpop.eup %2733  ;;  %v1895_v40 = vadd.f32 -1.0, %v2732_v7  ;;  %v3176_v50 = vpop.permute.xlu1 %1079 }
 0x6eb   :  { %v2736_v41 = vpop.eup %2735  ;;  %v1896_v42 = vadd.f32 -1.0, %v2734_v34 }
 0x6ec   :  { %v3137_v43 = vsel %vm910_vm8, %v907_v30, %v1895_v40  ;;  %v1897_v44 = vadd.f32 -1.0, %v2736_v41 }
 0x6ed   :  { %v3139_v45 = vsel %vm911_vm9, %v908_v31, %v1896_v42  ;;  %966 = vrot.lane.b32.xlu1 %v3137_v43, %s2843_s9  ;;  %v953_v31 = vmul.f32 12.0, %v950_v23  ;;  %vm1045_vm9 = vcmp.lt.f32.partialorder %v3214_v38, 14.0 }
 0x6ee   :  { %968 = vrot.lane.b32.xlu0 %v3139_v45, %s2843_s9  ;;  %v3143_v46 = vsel %vm912_vm10, %v909_v32, %v1897_v44  ;;  %v955_v32 = vmul.f32 12.0, %v952_v24  ;;  %v964_v63 = vmul.f32 %v3172_v48, %v3139_v45 }
 0x6ef   :  { %v3178_v51 = vpop.permute.xlu1 %1108  ;;  %v3218_v7 = vsub.f32 %v938_v13, %v953_v31  ;;  %v965_v2 = vmul.f32 %v3172_v48, %v3143_v46 }
 0x6f0   :  { %v3220_v34 = vsub.f32 %v940_v14, %v955_v32 }
 0x6f1   :  { %1004 = vrot.lane.b32.xlu1 %v3137_v43, %s2844_s10  ;;  %vm976_vm3 = vcmp.ge.f32.partialorder %v3218_v7, 2.0 }
 0x6f2   :  { %970 = vrot.lane.b32.xlu0 %v3143_v46, %s2843_s9  ;;  %vm978_vm4 = vcmp.ge.f32.partialorder %v3220_v34, 2.0  ;;  %vm3265_vm8 = vmand %vm976_vm3, %vm979_vm15 }
 0x6f3   :  { %vm3278_vm10 = vmand %vm978_vm4, %vm3538_vm1  ;;  %vm1196_vm1 = vcmp.lt.s32.totalorder %v3184_v57, 94 }
 0x6f4   :  { %v3180_v52 = vpop.permute.xlu1 %1143 }
 0x6f5   :  { %1033 = vrot.lane.b32.xlu1 %v3137_v43, %s2845_s11 }
 0x6f6   :  { %1006 = vrot.lane.b32.xlu0 %v3139_v45, %s2844_s10 }
 0x6f9   :  { %1068 = vrot.lane.b32.xlu1 %v3137_v43, %s2846_s12  ;;  %v3182_v53 = vpop.permute.xlu1 %1172 }
 0x6fa   :  { %1008 = vrot.lane.b32.xlu0 %v3143_v46, %s2844_s10 }
 0x6fd   :  { %1099 = vrot.lane.b32.xlu1 %v3139_v45, %s2847_s13 }
 0x6fe   :  { %1035 = vrot.lane.b32.xlu0 %v3139_v45, %s2845_s11  ;;  %v3186_v58 = vpop.permute.xlu1 %1204 }
 0x701   :  { %1128 = vrot.lane.b32.xlu1 %v3139_v45, %s2848_s14 }
 0x702   :  { %1037 = vrot.lane.b32.xlu0 %v3143_v46, %s2845_s11 }
 0x705   :  { %1126 = vrot.lane.b32.xlu1 %v3137_v43, %s2848_s14 }
 0x706   :  { %1070 = vrot.lane.b32.xlu0 %v3139_v45, %s2846_s12 }
 0x709   :  { %1165 = vrot.lane.b32.xlu1 %v3143_v46, %s2849_s15 }
 0x70a   :  { %1072 = vrot.lane.b32.xlu0 %v3143_v46, %s2846_s12 }
 0x70d   :  { %1192 = vrot.lane.b32.xlu1 %v3139_v45, %s2850_s16 }
 0x70e   :  { %1101 = vrot.lane.b32.xlu0 %v3143_v46, %s2847_s13 }
 0x711   :  { %1190 = vrot.lane.b32.xlu1 %v3137_v43, %s2850_s16 }
 0x712   :  { %1097 = vrot.lane.b32.xlu0 %v3137_v43, %s2847_s13 }
 0x716   :  { %1130 = vrot.lane.b32.xlu0 %v3143_v46, %s2848_s14 }
 0x71a   :  { %1163 = vrot.lane.b32.xlu0 %v3139_v45, %s2849_s15 }
 0x71e   :  { %1161 = vrot.lane.b32.xlu0 %v3137_v43, %s2849_s15 }
 0x722   :  { %1194 = vrot.lane.b32.xlu0 %v3143_v46, %s2850_s16 }
 0x75f   :  { %v967_v62 = vpop.permute.xlu1 %966 }
 0x760   :  { %v969_v1 = vpop.permute.xlu0 %968 }
 0x761   :  { %v974_v39 = vsel %vm972_vm11, %v967_v62, %v969_v1 }
 0x762   :  { %v990_v42 = vmul.f32 %v3170_v47, %v974_v39 }
 0x763   :  { %v1005_v5 = vpop.permute.xlu1 %1004 }
 0x764   :  { %v971_v6 = vpop.permute.xlu0 %970 }
 0x765   :  { %v975_v44 = vsel %vm972_vm11, %v971_v6, %v967_v62  ;;  %v973_v60 = vsel %vm972_vm11, %v969_v1, %v971_v6  ;;  %v963_v62 = vmul.f32 %v3172_v48, %v3137_v43  ;;  %v999_v43 = vsel %vm3236_vm2, %v990_v42, 0.0 }
 0x766   :  { %v989_v3 = vmul.f32 %v3170_v47, %v975_v44  ;;  %v991_v46 = vmul.f32 %v3170_v47, %v973_v60  ;;  %vm1132_vm11 = vcmp.lt.s32.totalorder %v3184_v57, 98  ;;  %vm1074_vm2 = vcmp.lt.s32.totalorder %v3184_v57, 2 }
 0x767   :  { %v3193_v11 = vpop.permute.xlu1 %1033  ;;  %v1002_v13 = vadd.f32 %v999_v43, %v964_v63 }
 0x768   :  { %v3195_v12 = vpop.permute.xlu0 %1006  ;;  %v998_v14 = vsel %vm3265_vm8, %v989_v3, 0.0  ;;  %vm1136_vm8 = vcmp.lt.f32.partialorder %v3218_v7, 10.0 }
 0x769   :  { %v1012_v61 = vsel %vm1010_vm14, %v1005_v5, %v3195_v12 }
 0x76a   :  { %v1019_v48 = vmul.f32 %v3188_v59, %v1012_v61 }
 0x76b   :  { %v3197_v16 = vpop.permute.xlu1 %1068 }
 0x76c   :  { %v1009_v17 = vpop.permute.xlu0 %1008 }
 0x76d   :  { %v1013_v1 = vsel %vm1010_vm14, %v1009_v17, %v1005_v5  ;;  %v1011_v47 = vsel %vm1010_vm14, %v3195_v12, %v1009_v17  ;;  %vm1138_vm14 = vcmp.lt.f32.partialorder %v3220_v34, 10.0  ;;  %v1000_v12 = vsel %vm3278_vm10, %v991_v46, 0.0  ;;  %vm3320_vm10 = vmand %vm976_vm3, %vm1043_vm7 }
 0x76e   :  { %v1018_v9 = vmul.f32 %v3188_v59, %v1013_v1  ;;  %v1020_v20 = vmul.f32 %v3188_v59, %v1011_v47  ;;  %v1001_v59 = vadd.f32 %v998_v14, %v963_v62  ;;  %v1003_v31 = vadd.f32 %v1000_v12, %v965_v2 }
 0x76f   :  { %v3199_v21 = vpop.permute.xlu1 %1099 }
 0x770   :  { %v3201_v22 = vpop.permute.xlu0 %1035  ;;  %v1027_v26 = vsel %vm976_vm3, %v1018_v9, 0.0  ;;  %vm3553_vm3 = vcmp.ge.f32.partialorder %v3214_v38, 2.0 }
 0x771   :  { %v1041_v10 = vsel %vm1039_vm5, %v3193_v11, %v3201_v22  ;;  %v1030_v61 = vadd.f32 %v1027_v26, %v1001_v59 }
 0x772   :  { %v1054_v23 = vmul.f32 %v3174_v49, %v1041_v10 }
 0x773   :  { %v3203_v30 = vpop.permute.xlu1 %1128 }
 0x774   :  { %v1038_v27 = vpop.permute.xlu0 %1037 }
 0x775   :  { %v1042_v8 = vsel %vm1039_vm5, %v1038_v27, %v3193_v11  ;;  %v1028_v11 = vsel %vm977_vm12, %v1019_v48, 0.0  ;;  %v1040_v17 = vsel %vm1039_vm5, %v3201_v22, %v1038_v27  ;;  %vm3337_vm5 = vmand %vm977_vm12, %vm1044_vm6 }
 0x776   :  { %v1053_v19 = vmul.f32 %v3174_v49, %v1042_v8  ;;  %v1031_v32 = vadd.f32 %v1028_v11, %v1002_v13  ;;  %v1055_v39 = vmul.f32 %v3174_v49, %v1040_v17  ;;  %vm3355_vm12 = vmand %vm978_vm4, %vm1045_vm9  ;;  %v1063_v62 = vsel %vm3337_vm5, %v1054_v23, 0.0 }
 0x777   :  { %v3225_v40 = vpop.permute.xlu1 %1126 }
 0x778   :  { %v3210_v36 = vpop.permute.xlu0 %1070  ;;  %v1064_v43 = vsel %vm3355_vm12, %v1055_v39, 0.0  ;;  %vm3420_vm12 = vmand %vm1136_vm8, %vm979_vm15 }
 0x779   :  { %v1076_v22 = vsel %vm1074_vm2, %v3197_v16, %v3210_v36 }
 0x77b   :  { %v3272_v5 = vpop.permute.xlu1 %1165 }
 0x77c   :  { %v1073_v41 = vpop.permute.xlu0 %1072 }
 0x77d   :  { %v1077_v15 = vsel %vm1074_vm2, %v1073_v41, %v3197_v16  ;;  %v1075_v16 = vsel %vm1074_vm2, %v3210_v36, %v1073_v41  ;;  %v1062_v36 = vsel %vm3320_vm10, %v1053_v19, 0.0  ;;  %v1083_v41 = vmul.f32 %v3176_v50, %v1076_v22  ;;  %vm3558_vm10 = vmmov %vm3553_vm3 }
 0x77e   :  { %v1082_v28 = vmul.f32 %v3176_v50, %v1077_v15  ;;  %v1084_v63 = vmul.f32 %v3176_v50, %v1075_v16  ;;  %v1065_v45 = vadd.f32 %v1062_v36, %v1030_v61  ;;  %v1134_v50 = vsel %vm1132_vm11, %v3225_v40, %v3203_v30  ;;  %vm3412_vm5 = vmand %vm1138_vm14, %vm3558_vm10 }
 0x77f   :  { %v3345_v29 = vpop.permute.xlu1 %1192  ;;  %v1066_v15 = vadd.f32 %v1063_v62, %v1031_v32  ;;  %v1146_v12 = vmul.f32 %v3180_v52, %v1134_v50 }
 0x780   :  { %v1102_v4 = vpop.permute.xlu0 %1101  ;;  %v1091_v2 = vsel %vm979_vm15, %v1082_v28, 0.0  ;;  %v1093_v13 = vsel %vm3553_vm3, %v1084_v63, 0.0  ;;  %vm1202_vm3 = vmand %vm1138_vm14, %vm1045_vm9 }
 0x781   :  { %v1104_v42 = vsel %vm1103_vm0, %v3199_v21, %v1102_v4  ;;  %v1094_v14 = vadd.f32 %v1091_v2, %v1065_v45  ;;  %v1155_v39 = vsel %vm3420_vm12, %v1146_v12, 0.0 }
 0x782   :  { %v1112_v3 = vmul.f32 %v3178_v51, %v1104_v42 }
 0x783   :  { %v1191_v47 = vpop.permute.xlu1 %1190 }
 0x784   :  { %v1098_v18 = vpop.permute.xlu0 %1097  ;;  %v1121_v11 = vsel %vm1044_vm6, %v1112_v3, 0.0 }
 0x785   :  { %v1105_v25 = vsel %vm1103_vm0, %v1098_v18, %v3199_v21  ;;  %v1106_v49 = vsel %vm1103_vm0, %v1102_v4, %v1098_v18  ;;  %v1029_v21 = vsel %vm978_vm4, %v1020_v20, 0.0  ;;  %vm3552_vm0 = vcmp.ge.f32.partialorder %v3205_v33, 2.0 }
 0x786   :  { %v1111_v60 = vmul.f32 %v3178_v51, %v1105_v25  ;;  %v1113_v46 = vmul.f32 %v3178_v51, %v1106_v49  ;;  %v1032_v6 = vadd.f32 %v1029_v21, %v1003_v31  ;;  %v1092_v8 = vsel %vm3552_vm0, %v1083_v41, 0.0  ;;  %vm3554_vm4 = vmmov %vm3552_vm0 }
 0x787   :  { %v1095_v25 = vadd.f32 %v1092_v8, %v1066_v15 }
 0x788   :  { %v1131_v44 = vpop.permute.xlu0 %1130  ;;  %v1120_v9 = vsel %vm1043_vm7, %v1111_v60, 0.0  ;;  %v1067_v18 = vadd.f32 %v1064_v43, %v1032_v6  ;;  %v1122_v20 = vsel %vm1045_vm9, %v1113_v46, 0.0  ;;  %v2739_v6 = vld [vmem:[#allocation5] sm:$0xff] }
 0x789   :  { %v1133_v1 = vsel %vm1132_vm11, %v3203_v30, %v1131_v44  ;;  %v1135_v4 = vsel %vm1132_vm11, %v1131_v44, %v3225_v40  ;;  %vm3555_vm11 = vcmp.lt.f32.partialorder %v3207_v35, 10.0  ;;  %v1123_v23 = vadd.f32 %v1120_v9, %v1094_v14  ;;  %1517 = vrot.lane.b32.xlu1 %v2739_v6, %s2851_s17 }
 0x78a   :  { %vm3399_vm2 = vmand %vm3555_vm11, %vm3554_vm4  ;;  %v1147_v30 = vmul.f32 %v3180_v52, %v1133_v1  ;;  %v1148_v40 = vmul.f32 %v3180_v52, %v1135_v4  ;;  %v1198_v52 = vsel %vm1196_vm1, %v1191_v47, %v3345_v29  ;;  %v1096_v59 = vadd.f32 %v1093_v13, %v1067_v18 }
 0x78b   :  { %v1124_v42 = vadd.f32 %v1121_v11, %v1095_v25  ;;  %v1207_v44 = vmul.f32 %v3186_v58, %v1198_v52  ;;  %vm3563_vm15 = vmmov %vm3555_vm11  ;;  %v1158_v36 = vadd.f32 %v1155_v39, %v1123_v23 }
 0x78c   :  { %v1164_v48 = vpop.permute.xlu0 %1163  ;;  %v1156_v16 = vsel %vm3399_vm2, %v1147_v30, 0.0  ;;  %v1157_v28 = vsel %vm3412_vm5, %v1148_v40, 0.0  ;;  %v1125_v54 = vadd.f32 %v1122_v20, %v1096_v59 }
 0x78d   :  { %v1168_v10 = vsel %vm1167_vm13, %v1164_v48, %v3272_v5  ;;  %v1159_v21 = vadd.f32 %v1156_v16, %v1124_v42 }
 0x78e   :  { %v1176_v24 = vmul.f32 %v3182_v53, %v1168_v10  ;;  %v1160_v61 = vadd.f32 %v1157_v28, %v1125_v54 }
 0x790   :  { %v1162_v22 = vpop.permute.xlu0 %1161 }
 0x791   :  { %v1169_v26 = vsel %vm1167_vm13, %v1162_v22, %v1164_v48  ;;  %v1170_v27 = vsel %vm1167_vm13, %v3272_v5, %v1162_v22  ;;  %v1185_v5 = vsel %vm3563_vm15, %v1176_v24, 0.0  ;;  %vm3564_vm13 = vmmov %vm3555_vm11 }
 0x792   :  { %v1175_v31 = vmul.f32 %v3182_v53, %v1169_v26  ;;  %v1177_v32 = vmul.f32 %v3182_v53, %v1170_v27  ;;  %vm3454_vm0 = vmand %vm3564_vm13, %vm1044_vm6  ;;  %v1188_v2 = vadd.f32 %v1185_v5, %v1159_v21  ;;  %v2740_v27 = vld [vmem:[#allocation5 + $0x8] sm:$0xff]  ;;  %v2741_v21 = vld [vmem:[#allocation2] sm:$0xff] }
 0x793   :  { %vm1200_vm6 = vmand %vm1136_vm8, %vm1043_vm7  ;;  %vm1571_vm7 = vcmask 64512  }
 0x794   :  { %v1184_v41 = vsel %vm1136_vm8, %v1175_v31, 0.0  ;;  %v1186_v49 = vsel %vm1138_vm14, %v1177_v32, 0.0  ;;  %v1195_v60 = vpop.permute.xlu0 %1194 }
 0x795   :  { %v1197_v62 = vsel %vm1196_vm1, %v3345_v29, %v1195_v60  ;;  %v1199_v33 = vsel %vm1196_vm1, %v1195_v60, %v1191_v47  ;;  %v1187_v35 = vadd.f32 %v1184_v41, %v1158_v36  ;;  %v1189_v34 = vadd.f32 %v1186_v49, %v1160_v61 }
 0x796   :  { %v1208_v63 = vmul.f32 %v3186_v58, %v1197_v62  ;;  %v1209_v38 = vmul.f32 %v3186_v58, %v1199_v33  ;;  %v1216_v29 = vsel %vm1200_vm6, %v1207_v44, 0.0  ;;  %vm3567_vm1 = vmmov 0   ;;  %v2742_v62 = vld [vmem:[#allocation2 + $0x8] sm:$0xff] }
 0x797   :  { %v1219_v43 = vadd.f32 %v1216_v29, %v1187_v35  ;;  %v2743_v29 = vld [vmem:[#allocation2 + $0x18] sm:$0xff] }
 0x798   :  { %v1217_v3 = vsel %vm3454_vm0, %v1208_v63, 0.0  ;;  %v1218_v1 = vsel %vm1202_vm3, %v1209_v38, 0.0 }
 0x799   :  { %v1221_v4 = vadd.f32 %v1218_v1, %v1189_v34  ;;  %v1220_v57 = vadd.f32 %v1217_v3, %v1188_v2 }
 0x79b   :  { %1286 = vmatprep.mubr.f32.mxu1 %v1220_v57  ;;  %2413 = vmatmul.mubr.f32.vlgmr.msra.gmra.mrb[14].mxu0 %v1221_v4 }
 0x79c   :  { %1287 = vmatmul.mubr.f32.vlgmr.msra.gmra.mrb[10].mxu1 %v1219_v43  ;;  %2644 = vmatpush3.bf16.msra.mxu0 %v2825_v0 }
 0x79d   :  { %2628 = vmatpush3.bf16.msra.mxu1 %v2825_v0  ;;  %2645 = vmatprep.subr.bf16.mxu0 %v2829_v55 }
 0x79e   :  { %2629 = vmatprep.subr.bf16.mxu1 %v2825_v0  ;;  %2447 = vmatprep.mubr.msk.f32.mxu0 %vm3567_vm1, %v2830_v56 }
 0x7a0   :  { %2646 = vmatpush3.bf16.msra.mxu0 %v2825_v0 }
 0x7a1   :  { %2630 = vmatpush3.bf16.msra.mxu1 %v2825_v0  ;;  %2647 = vmatprep.subr.bf16.mxu0 %v2829_v55 }
 0x7a2   :  { %2631 = vmatprep.subr.bf16.mxu1 %v2825_v0 }
 0x7a4   :  { %2648 = vmatpush3.bf16.msra.mxu0 %v2825_v0 }
 0x7a5   :  { %2632 = vmatpush3.bf16.msra.mxu1 %v2825_v0  ;;  %2649 = vmatprep.subr.bf16.mxu0 %v2829_v55 }
 0x7a6   :  { %2633 = vmatprep.subr.bf16.mxu1 %v2825_v0 }
 0x7a8   :  { %2650 = vmatpush3.bf16.msra.mxu0 %v2825_v0 }
 0x7a9   :  { %2634 = vmatpush3.bf16.msra.mxu1 %v2825_v0  ;;  %2651 = vmatprep.subr.bf16.mxu0 %v2829_v55 }
 0x7aa   :  { %2635 = vmatprep.subr.bf16.mxu1 %v2825_v0 }
 0x7ac   :  { %2652 = vmatpush3.bf16.msra.mxu0 %v2825_v0 }
 0x7ad   :  { %2636 = vmatpush3.bf16.msra.mxu1 %v2825_v0  ;;  %2653 = vmatprep.subr.bf16.mxu0 %v2829_v55 }
 0x7ae   :  { %2637 = vmatprep.subr.bf16.mxu1 %v2825_v0 }
 0x7b0   :  { %2654 = vmatpush3.bf16.msra.mxu0 %v2825_v0 }
 0x7b1   :  { %2638 = vmatpush3.bf16.msra.mxu1 %v2825_v0  ;;  %2655 = vmatprep.subr.bf16.mxu0 %v2829_v55 }
 0x7b2   :  { %2639 = vmatprep.subr.bf16.mxu1 %v2825_v0 }
 0x7b4   :  { %2656 = vmatpush3.bf16.msra.mxu0 %v2825_v0 }
 0x7b5   :  { %2640 = vmatpush3.bf16.msra.mxu1 %v2825_v0  ;;  %2657 = vmatprep.subr.bf16.mxu0 %v2829_v55 }
 0x7b6   :  { %2641 = vmatprep.subr.bf16.mxu1 %v2825_v0 }
 0x7b8   :  { %2658 = vmatpush3.bf16.msra.mxu0 %v2825_v0 }
 0x7b9   :  { %2642 = vmatpush3.bf16.msra.mxu1 %v2825_v0 }
 0x7fb   :  { %v1518_v19 = vpop.permute.xlu1 %1517 }
 0x86e   :  { %v1358_v58 = vpop.f32.mrb[14].mxu0 }
 0x86f   :  { %v2155_v37 = vpop.f32.mrb[10].mxu1  ;;  %v2414_v7 = vpop.f32.mrb[15].mxu0 }
 0x870   :  { %v2156_v45 = vpop.f32.mrb[11].mxu1  ;;  %v2746_v7 = vld [vmem:[#allocation2 + $0x10] sm:$0xff] }
 0x871   :  { %v2157_v50 = vadd.f32 %v2156_v45, %v2155_v37 }
 0x873   :  { %v1359_v46 = vadd.f32 %v2157_v50, %v1358_v58  ;;  %v2745_v58 = vld [vmem:[#allocation2 + $0x20] sm:$0xff] }
 0x875   :  { %v1362_v48 = vmul.f32 0.0026041667, %v1359_v46 }
 0x877   :  { %1365 = vperm.xlu0 %2711, %v1362_v48  }
 0x87b   :  { %1527 = vrot.lane.b32.xlu0 %v2739_v6, %s2852_s18 }
 0x8f6   :  { %v1366_v55 = vpop.permute.xlu0 %1365 }
 0x8f7   :  { %v1368_v8 = vsub.f32 %v1219_v43, %v1366_v55  ;;  %v1369_v47 = vsub.f32 %v1220_v57, %v1366_v55  ;;  %v1370_v9 = vsub.f32 %v1221_v4, %v1366_v55  ;;  %v2744_v57 = vld [vmem:[#allocation2 + $0x28] sm:$0xff] }
 0x8f9   :  { %v1371_v10 = vmul.f32 %v1368_v8, %v1368_v8  ;;  %1705 = vmatprep.subr.mxu0 %v1369_v47  ;;  %v1372_v0 = vmul.f32 %v1369_v47, %v1369_v47  ;;  %v1373_v13 = vmul.f32 %v1370_v9, %v1370_v9 }
 0x8fa   :  { %v1528_v14 = vpop.permute.xlu0 %1527 }
 0x8fb   :  { %1438 = vmatprep.mubr.f32.mxu1 %v1372_v0  ;;  %2448 = vmatmul.mubr.f32.vlgmr.msra.gmra.mrb[16].mxu0 %v1373_v13 }
 0x8fc   :  { %1706 = vmatpush1.msra.mxu0 %v1368_v8  ;;  %1439 = vmatmul.mubr.f32.vlgmr.msra.gmra.mrb[12].mxu1 %v1371_v10 }
 0x8fd   :  { %1769 = vmatprep.mubr.f32.mxu0 %v2830_v56  ;;  %1530 = vxpose.xlu0.b32.start.end [1/1] (short) (narrow) %v1528_v14, 16 }
 0x92a   :  { %1565 = vrot.lane.b32.xlu0 %v2739_v6, %s2847_s13 }
 0x97d   :  { %v1546_v23 = vpop.trf.xlu0 }
 0x97e   :  { %2452 = vmatprep.mubr.msk.f32.mxu1 %vm1571_vm7, %v1546_v23 }
 0x981   :  { %v1547_v59 = vpop.trf.xlu0 }
 0x99c   :  { %v1566_v16 = vpop.permute.xlu0 %1565 }
 0x9ce   :  { %v1510_v51 = vpop.f32.mrb[16].mxu0 }
 0x9cf   :  { %v2207_v30 = vpop.f32.mrb[12].mxu1  ;;  %v2449_v40 = vpop.f32.mrb[17].mxu0 }
 0x9d0   :  { %v2208_v15 = vpop.f32.mrb[13].mxu1 }
 0x9d1   :  { %v2209_v18 = vadd.f32 %v2208_v15, %v2207_v30 }
 0x9d3   :  { %v1511_v12 = vadd.f32 %v2209_v18, %v1510_v51 }
 0x9d5   :  { %v1514_v11 = vmul.f32 0.0026041667, %v1511_v12 }
 0x9d7   :  { %v1515_v17 = vadd.f32 1e-05, %v1514_v11 }
 0x9d9   :  { %2737 = vrsqrt.f32 %v1515_v17 }
 0x9e3   :  { %v2738_v52 = vpop.eup %2737 }
 0x9e4   :  { %v1520_v20 = vmul.f32 %v2738_v52, %v1518_v19 }
 0x9e6   :  { %1523 = vperm.xlu1 %2712, %v1520_v20  }
 0x9ea   :  { %1562 = vrot.lane.b32.xlu1 %v2739_v6, %s2853_s21 }
 0xa65   :  { %v1524_v24 = vpop.permute.xlu1 %1523 }
 0xa66   :  { %v1526_v22 = vmul.f32 %v2739_v6, %v1524_v24 }
 0xa68   :  { %1664 = vrot.lane.b32.xlu1 %v1526_v22, %s2852_s18 }
 0xa69   :  { %v1563_v25 = vpop.permute.xlu1 %1562 }
 0xa6a   :  { %2450 = vmatprep.subr.mxu1 %v1563_v25 }
 0xa6b   :  { %2451 = vmatpush3.msra.mxu1 %v1563_v25 }
 0xa6c   :  { %2453 = vmatmul.mubr.msk.f32.vlgmr.msra.gmra.mrb[14].mxu1 %vm1571_vm7, %v1547_v59  ;;  %2455 = vmatprep.subr.mxu1 %v1370_v9 }
 0xa6d   :  { %2456 = vmatpush3.msra.mxu1 %v1370_v9 }
 0xada   :  { %v1665_v26 = vpop.permute.xlu1 %1664 }
 0xadb   :  { %1667 = vxpose.xlu1.b32.start.end [1/1] (short) (narrow) %v1665_v26, 16 }
 0xafd   :  { %1567 = vrot.lane.b32.xlu1 %v2740_v27, %s2847_s13 }
 0xb3f   :  { %v2454_v28 = vpop.f32.mrb[14].mxu1 }
 0xb40   :  { %v1644_v31 = vpop.f32.mrb[15].mxu1 }
 0xb41   :  { %v1645_v32 = vadd.f32 %v1644_v31, %v1566_v16 }
 0xb43   :  { %1655 = vperm.xlu0 %2711, %v1645_v32  }
 0xb5b   :  { %v1683_v39 = vpop.trf.xlu1 }
 0xb5c   :  { %1900 = vmatmul.mubr.msk.f32.vlgmr.msra.gmra.mrb[18].mxu0 %vm1571_vm7, %v1683_v39  ;;  %2457 = vmatprep.mubr.msk.f32.mxu1 %vm1571_vm7, %v1683_v39 }
 0xb5d   :  { %1775 = vmatprep.mubr.f32.mxu0 %v2830_v56 }
 0xb5f   :  { %v1684_v42 = vpop.trf.xlu1 }
 0xb60   :  { %1901 = vmatmul.mubr.msk.f32.gmra.mrb[20].mxu0 %vm1571_vm7, %v1684_v42  ;;  %2458 = vmatmul.mubr.msk.f32.vlgmr.msra.gmra.mrb[16].mxu1 %vm1571_vm7, %v1684_v42 }
 0xb6f   :  { %v1568_v44 = vpop.permute.xlu1 %1567 }
 0xb70   :  { %v1650_v54 = vadd.f32 %v2454_v28, %v1568_v44 }
 0xb72   :  { %1660 = vperm.xlu0 %2711, %v1650_v54  }
 0xbc2   :  { %v1656_v5 = vpop.permute.xlu0 %1655 }
 0xbf1   :  { %v1661_v60 = vpop.permute.xlu0 %1660 }
 0xc2f   :  { %v1771_v36 = vpop.f32.mrb[18].mxu0 }
 0xc30   :  { %v1772_v41 = vadd.f32 %v1771_v36, %v1656_v5  ;;  %v1773_v49 = vpop.f32.mrb[19].mxu0 }
 0xc31   :  { %v1774_v53 = vadd.f32 %v1773_v49, %v1656_v5 }
 0xc32   :  { %v1857_v61 = vadd.f32 %v2741_v21, %v1772_v41 }
 0xc33   :  { %v1858_v33 = vadd.f32 %v2742_v62, %v1774_v53  ;;  %v1777_v35 = vpop.f32.mrb[20].mxu0  ;;  %v2459_v56 = vpop.f32.mrb[16].mxu1 }
 0xc34   :  { %1863 = vst [vmem:[#allocation7] sm:$0xff] %v1857_v61  ;;  %v1778_v63 = vadd.f32 %v1777_v35, %v1661_v60  ;;  %v1854_v38 = vadd.f32 %v2459_v56, %v1661_v60  ;;  %v1779_v2 = vpop.f32.mrb[21].mxu0  ;;  %v1848_v34 = vpop.f32.mrb[17].mxu1 }
 0xc35   :  { %1864 = vst [vmem:[#allocation7 + $0x8] sm:$0xff] %v1858_v33  ;;  %v1780_v3 = vadd.f32 %v1779_v2, %v1661_v60  ;;  %v1849_v1 = vadd.f32 %v1848_v34, %v1656_v5 }
 0xc36   :  { %v1860_v4 = vadd.f32 %v2743_v29, %v1778_v63  ;;  %v1862_v43 = vadd.f32 %v2744_v57, %v1854_v38 }
 0xc37   :  { %v1861_v37 = vadd.f32 %v2745_v58, %v1780_v3  ;;  %v1859_v45 = vadd.f32 %v2746_v7, %v1849_v1 }
 0xc38   :  { %1866 = vst [vmem:[#allocation7 + $0x18] sm:$0xff] %v1860_v4  ;;  %1868 = vst [vmem:[#allocation7 + $0x28] sm:$0xff] %v1862_v43 }
 0xc39   :  { %1867 = vst [vmem:[#allocation7 + $0x20] sm:$0xff] %v1861_v37  ;;  %1865 = vst [vmem:[#allocation7 + $0x10] sm:$0xff] %v1859_v45 }
 0xc3a   :  { %2802 = shalt.err (!%p2799_p6)
}
 0xc3b   :  { %s2803_s27 = scalar_lea.hbm %s3536_s2, 768 }
 0xc3c   :  { %p2804_p7 = scmp.ne.s32.totalorder %s3536_s2, %s2803_s27  ;;  %p2807_p8 = scmp.lt.u32.totalorder %s2803_s27, %s3536_s2 }
 0xc3e   :  { %p2809_p9 = pnand %p2807_p8, %p2804_p7 }
 0xc40   :  { %2812 = shalt.err (!%p2809_p9)
}
 0xc41   :  { %1880 = dma.vmem_to_hbm [thread:$0]  %s1875_s23, 768, %s3536_s2, [#allocation4], %s2820_s19, %s2820_s19, %s2821_s20  }
 0xc42   :  { %2817 = dma.done.wait [#allocation4], 768  }
 0xc43   :  { %2818 = vsyncadd [#allocation4], 4294966528 }
 0xc44   :  { %1884 = vsyncpa [#allocation3], 1 }
 0xc45   :  { %1885 = vsyncpa [#allocation6], 1 }
 0xc46   :  { %1886 = vsyncpa [#allocation4], 1 }

</bundles_post_ra>
